<compile_context>
chip_gen: v7x
topology: tpu7x:2x2x1
jax: 0.10.0
libtpu: 0.0.40
codegen_flags: <defaults>
</compile_context>

<pallas_src>
import functools

import jax
import jax.numpy as jnp
import numpy as np
from jax import lax
from jax.experimental import pallas as pl
from jax.experimental.pallas import tpu as pltpu


# --------------------------------------------------------------------------
# In-kernel helpers
# --------------------------------------------------------------------------
def _feat_mask(hp, hidden):
    """1.0 for real feature columns (< hidden), 0.0 for lane padding."""
    if hp == hidden:
        return None
    return (lax.broadcasted_iota(jnp.int32, (1, 1, hp), 2) < hidden
            ).astype(jnp.float32)


def _layernorm_relu(ctx, gamma, beta, *, eps, hidden, feat_mask):
    # torch.std is unbiased (ddof=1); eps is added to sigma, not variance.
    # ctx is (TB, tS, Hp); padded columns (>= hidden) are exactly zero by
    # construction, so the sum over Hp equals the sum over hidden.
    gamma = gamma.reshape((1, 1, gamma.shape[-1]))
    beta = beta.reshape((1, 1, beta.shape[-1]))
    mu = jnp.sum(ctx, axis=-1, keepdims=True) * (1.0 / hidden)
    diff = ctx - mu
    d = diff if feat_mask is None else diff * feat_mask
    var = jnp.sum(d * d, axis=-1, keepdims=True) * (1.0 / (hidden - 1))
    sigma = jnp.sqrt(var)
    inv = 1.0 / (sigma + eps)      # exact: (TB,tS,1) is tiny, approx buys nothing
    ln = diff * inv * gamma + beta                      # padded cols -> 0
    return jnp.maximum(ln, 0.0)


# --------------------------------------------------------------------------
# Kernels
# --------------------------------------------------------------------------
def _gcn_kernel_plain(x_ref, adj_ref, wt_ref, b_ref, g_ref, beta_ref,
                      out_ref, h_ref, *, eps, hidden):
    # use_weight=False path: delta_exp_u == adjacency_matrix.
    tb, seq, h_in = x_ref.shape           # x block: (TB, S, H)
    hp = out_ref.shape[-1]                # padded feature dim (multiple of 128)

    # h = x @ W.T + b, computed once per batch block and reused for every
    # query-row tile (innermost "arbitrary" axis; h_ref persists across it).
    @pl.when(pl.program_id(1) == 0)
    def _():
        xf = x_ref[...].reshape(tb * seq, h_in).astype(jnp.bfloat16)
        h = jnp.dot(xf, wt_ref[...], preferred_element_type=jnp.float32)
        h = h + b_ref[...]
        h_ref[...] = h.reshape(tb, seq, hp).astype(jnp.bfloat16)

    # Adjacency arrives at 1 byte/element; widen once (row-sum + bf16 MXU feed).
    adj_f = adj_ref[...].astype(jnp.float32)                 # (TB, tS, S)
    row_sum = jnp.sum(adj_f, axis=2, keepdims=True)
    # Row-normalization deferred past the MXU:
    #   att @ h == (adj @ h) * (1 / rowsum)   (scalar associativity per row)
    ctx = jnp.einsum('bts,bsh->bth', adj_f.astype(jnp.bfloat16), h_ref[...],
                     preferred_element_type=jnp.float32)     # (TB, tS, Hp)
    ctx = ctx * (1.0 / (row_sum + 1e-10))

    out_ref[...] = _layernorm_relu(
        ctx, g_ref[...], beta_ref[...], eps=eps, hidden=hidden,
        feat_mask=_feat_mask(hp, hidden)).astype(out_ref.dtype)


def _gcn_kernel_weighted(x_ref, xrow_ref, adj_ref, adjT_ref, wl_ref, wr_ref,
                         wt_ref, b_ref, g_ref, beta_ref, out_ref, h_ref,
                         *, temper, eps, hidden):
    # use_weight=True path, row-tiled: query rows of this step are xrow_ref.
    tb, seq, h_in = x_ref.shape           # full S along axis 1
    ts = adj_ref.shape[1]                 # row tile
    hp = out_ref.shape[-1]
    si = pl.program_id(1)

    # h = x @ W.T + b for ALL rows (the "V" operand), hoisted to bf16 scratch.
    @pl.when(si == 0)
    def _():
        xf = x_ref[...].reshape(tb * seq, h_in).astype(jnp.bfloat16)
        h = jnp.dot(xf, wt_ref[...], preferred_element_type=jnp.float32)
        h = h + b_ref[...]
        h_ref[...] = h.reshape(tb, seq, hp).astype(jnp.bfloat16)

    x16 = x_ref[...].astype(jnp.bfloat16)                    # (TB, S, H)  keys
    xr16 = xrow_ref[...].astype(jnp.bfloat16)                # (TB, tS, H) queries
    xr_f = xr16.reshape(tb * ts, h_in)
    tL = jnp.dot(xr_f, wl_ref[...], preferred_element_type=jnp.float32)
    tR = jnp.dot(xr_f, wr_ref[...], preferred_element_type=jnp.float32)
    tL = tL.reshape(tb, ts, h_in).astype(jnp.bfloat16)
    tR = tR.reshape(tb, ts, h_in).astype(jnp.bfloat16)

    inv_t = 1.0 / temper
    # u_left[i,j] = x_i^T WL x_j / temper ; u_right[i,j] = x_i^T WR x_j / temper
    u_left = jnp.einsum('bik,bjk->bij', tL, x16,
                        preferred_element_type=jnp.float32) * inv_t
    u_right = jnp.einsum('bik,bjk->bij', tR, x16,
                         preferred_element_type=jnp.float32) * inv_t

    adj = adj_ref[...].astype(jnp.float32)                   # (TB, tS, S)
    adjT = adjT_ref[...].astype(jnp.float32)                 # adjacency^T rows

    # Fused triangular masking.  Original:
    #   u_left*triu(adj,1) + u_self*diag(adj) + u_right*triu(adj,1)^T
    # with u_self == u_left (module uses left_linear for m_self), so the first
    # two terms collapse to u_left*triu(adj,0); regions are disjoint -> where().
    row = si * ts + lax.broadcasted_iota(jnp.int32, (tb, ts, seq), 1)
    col = lax.broadcasted_iota(jnp.int32, (tb, ts, seq), 2)
    u = jnp.where(col >= row, u_left * adj, u_right * adjT)
    # TODO(synk): exp(u) is unclamped to match the PyTorch reference exactly; a
    # row-max subtraction (and bf16 exp on v6e/v7x) would be safer/faster but
    # changes semantics/accuracy.
    delta = jnp.exp(u) * adj
    row_sum = jnp.sum(delta, axis=2, keepdims=True)

    # Row-normalization deferred past the MXU (same identity as the plain path).
    ctx = jnp.einsum('bij,bjh->bih', delta.astype(jnp.bfloat16), h_ref[...],
                     preferred_element_type=jnp.float32)
    ctx = ctx * (1.0 / (row_sum + 1e-10))

    out_ref[...] = _layernorm_relu(
        ctx, g_ref[...], beta_ref[...], eps=eps, hidden=hidden,
        feat_mask=_feat_mask(hp, hidden)).astype(out_ref.dtype)


# --------------------------------------------------------------------------
# Generation-aware tiling / VMEM budgeting
# --------------------------------------------------------------------------
@functools.lru_cache(maxsize=1)
def _chip_profile():
    """(vmem_limit_bytes, tile_budget_bytes, tensorcores_per_chip, ts_floor)."""
    kind = ""
    try:
        kind = jax.devices()[0].device_kind.lower()
    except Exception:
        pass
    vmem_cap = None
    try:
        vmem_cap = int(pltpu.get_tpu_info().vmem_capacity_bytes)
    except Exception:
        vmem_cap = None
    if vmem_cap is None:
        # conservative fallback (v7x-sized) unless the kind clearly says otherwise
        vmem_cap = (128 if (kind and "v7" not in kind) else 64) * 1024 * 1024
    ncores = 2 if "v7" in kind else 1          # v7x: 2 TensorCores share the grid
    ts_floor = 128 if "v5" in kind else 256    # keep MXU M-utilization when row-tiling
    if vmem_cap >= 96 * 1024 * 1024:           # v5e / v6e: 128 MiB physical VMEM
        vmem_limit = 100 * 1024 * 1024
        budget = 80 * 1024 * 1024
    else:                                      # v7x: 64 MiB physical -> DMA headroom
        vmem_limit = 48 * 1024 * 1024
        budget = 26 * 1024 * 1024
    return vmem_limit, budget, ncores, ts_floor


def _auto_tiles(B, S, H, Hp, use_weight, adj_bytes, x_bytes, out_bytes,
                budget_bytes, ncores, ts_floor):
    """Pick (batch_block, row_tile) so the per-step VMEM working set fits."""
    tb_cap = max(1, B // ncores)               # >= ncores blocks on the parallel axis
    tb_cands = [d for d in range(tb_cap, 0, -1) if B % d == 0]
    ts_cands = [d for d in range(S, 0, -1)
                if S % d == 0 and (d == S or (d % 8 == 0 and d >= min(ts_floor, S)))]

    def cost(tb, ts):
        # double-buffered pipeline blocks: x / adj / [adjT + x row-tile] / out
        io = 2 * (tb * S * H * x_bytes + tb * ts * S * adj_bytes
                  + tb * ts * Hp * out_bytes)
        if use_weight:
            io += 2 * (tb * ts * S * adj_bytes + tb * ts * H * x_bytes)
        h_scr = tb * S * Hp * 2                            # hoisted bf16 h
        if use_weight:
            # peak live f32 (tS,S) temporaries after the mask fusion:
            # u_left, u_right, adj, adjT, u/exp/delta (+mask) ~ 6
            tmp = 6 * tb * ts * S * 4 + tb * S * H * 2 + 3 * tb * ts * Hp * 4
        else:
            # widened adjacency (f32 + bf16) + ctx/LayerNorm temporaries,
            # vs the h-compute phase under pl.when(si == 0)
            tmp = max(tb * ts * S * 6 + 3 * tb * ts * Hp * 4,
                      tb * S * (2 * H + 4 * Hp))
        return io + h_scr + tmp

    for ts in ts_cands:
        for tb in tb_cands:
            if cost(tb, ts) <= budget_bytes:
                return tb, ts
    return 1, ts_cands[-1]


# --------------------------------------------------------------------------
# Wrapper
# --------------------------------------------------------------------------
def gcn_layer(hidden_state, adjacency, params, use_weight=False,
              batch_block=None, row_tile=None, out_dtype=jnp.float32,
              adj_buffers=None):
    """Pallas GCNLayer forward.

    adjacency may be shipped narrow (int8/bf16 — exact only for binary /
    small-integer adjacency); it is widened in-kernel.  out_dtype=bf16 halves
    output writeback when downstream tolerates it.  adj_buffers=3 deepens the
    adjacency pipeline (only sensible on 128 MiB-VMEM chips).
    """
    B, S, H = hidden_state.shape
    assert adjacency.shape == (B, S, S)
    assert H > 1, "LayerNormalization early-return path (H == 1) not supported"
    temper = float(H) ** 0.5
    eps = 1e-3

    # Lane-dense padded feature dim (multiple of 128).
    Hp = max(128, ((H + 127) // 128) * 128)
    pad = Hp - H

    # Pre-packed parameters: transpose for x @ W.T, zero-pad the output feature
    # dim, pre-cast MXU weight operands to bf16.
    w_t = jnp.pad(params['W'].astype(jnp.float32).T,
                  ((0, 0), (0, pad))).astype(jnp.bfloat16)
    b = jnp.pad(params['b'].astype(jnp.float32).reshape(1, H), ((0, 0), (0, pad)))
    gamma = jnp.pad(params['gamma'].astype(jnp.float32).reshape(1, H),
                    ((0, 0), (0, pad)))
    beta = jnp.pad(params['beta'].astype(jnp.float32).reshape(1, H),
                   ((0, 0), (0, pad)))

    vmem_limit, budget, ncores, ts_floor = _chip_profile()
    tb_auto, ts_auto = _auto_tiles(
        B, S, H, Hp, use_weight,
        jnp.dtype(adjacency.dtype).itemsize, jnp.dtype(hidden_state.dtype).itemsize,
        jnp.dtype(out_dtype).itemsize, budget, ncores, ts_floor)
    tb = batch_block if batch_block is not None else tb_auto
    ts = row_tile if row_tile is not None else ts_auto
    assert B % tb == 0
    assert S % ts == 0 and (ts == S or ts % 8 == 0)

    grid = (B // tb, S // ts)
    bcast = lambda shape: pl.BlockSpec(shape, lambda bi, si: (0,) * len(shape))
    x_spec = pl.BlockSpec((tb, S, H), lambda bi, si: (bi, 0, 0))
    adj_kwargs = {}
    if adj_buffers is not None and adj_buffers != 2:
        adj_kwargs = dict(pipeline_mode=pl.Buffered(adj_buffers))
    adj_spec = pl.BlockSpec((tb, ts, S), lambda bi, si: (bi, si, 0), **adj_kwargs)
    out_spec = pl.BlockSpec((tb, ts, Hp), lambda bi, si: (bi, si, 0))
    scratch = [pltpu.VMEM((tb, S, Hp), jnp.bfloat16)]   # hoisted h = xW^T + b

    if use_weight:
        # adjacency^T hoisted out of the kernel (no in-kernel XLU transpose);
        # also what makes the weighted path row-tileable.
        adjT = jnp.swapaxes(adjacency, 1, 2)
        xrow_spec = pl.BlockSpec((tb, ts, H), lambda bi, si: (bi, si, 0))
        adjT_spec = pl.BlockSpec((tb, ts, S), lambda bi, si: (bi, si, 0))
        kernel = functools.partial(_gcn_kernel_weighted,
                                   temper=temper, eps=eps, hidden=H)
        inputs = (hidden_state, hidden_state, adjacency, adjT,
                  params['WL'].astype(jnp.bfloat16),
                  params['WR'].astype(jnp.bfloat16),
                  w_t, b, gamma, beta)
        in_specs = [x_spec, xrow_spec, adj_spec, adjT_spec,
                    bcast((H, H)), bcast((H, H)), bcast((H, Hp)),
                    bcast((1, Hp)), bcast((1, Hp)), bcast((1, Hp))]
    else:
        kernel = functools.partial(_gcn_kernel_plain, eps=eps, hidden=H)
        inputs = (hidden_state, adjacency, w_t, b, gamma, beta)
        in_specs = [x_spec, adj_spec, bcast((H, Hp)), bcast((1, Hp)),
                    bcast((1, Hp)), bcast((1, Hp))]

    out = pl.pallas_call(
        kernel,
        out_shape=jax.ShapeDtypeStruct((B, S, Hp), out_dtype),
        grid_spec=pltpu.PrefetchScalarGridSpec(
            num_scalar_prefetch=0,
            grid=grid,
            in_specs=in_specs,
            out_specs=out_spec,
            scratch_shapes=scratch),
        compiler_params=pltpu.CompilerParams(
            dimension_semantics=("parallel", "arbitrary"),
            vmem_limit_bytes=vmem_limit),
    )(*inputs)
    # TODO(synk): for H << 128 a masked (B,S,H) store variant would remove the
    # padded writeback + this slice pass; measure against the lane-dense layout.
    return out[..., :H] if pad else out


# ---------------- pure-JAX reference (mirrors the PyTorch code) -------------
def ref_forward(x, adj, params, use_weight):
    x = x.astype(jnp.float32)
    adj = adj.astype(jnp.float32)
    B, S, H = x.shape
    temper = float(H) ** 0.5
    if use_weight:
        m_left = jnp.einsum('bsh,oh->bso', x, params['WL'])   # left_linear
        m_self = m_left                                       # (same as original)
        m_right = jnp.einsum('bsh,oh->bso', x, params['WR'])
        u_left = jnp.einsum('bsh,bth->bst', x, m_left) / temper
        u_self = jnp.einsum('bsh,bth->bst', x, m_self) / temper
        u_right = jnp.einsum('bsh,bth->bst', x, m_right) / temper
        tri_u = jnp.triu(jnp.ones((S, S)), 1)
        diag = jnp.eye(S)
        adj_tri = adj * tri_u
        u = (u_left * adj_tri + u_right * jnp.swapaxes(adj_tri, 1, 2)
             + u_self * (adj * diag))
        delta = jnp.exp(u) * adj
    else:
        delta = adj
    row_sum = jnp.sum(delta, axis=2, keepdims=True)
    att = delta / (row_sum + 1e-10)
    h = jnp.einsum('bsh,oh->bso', x, params['W']) + params['b']
    ctx = jnp.einsum('bst,bth->bsh', att, h)
    mu = jnp.mean(ctx, axis=-1, keepdims=True)
    sigma = jnp.sqrt(jnp.sum((ctx - mu) ** 2, axis=-1, keepdims=True) / (H - 1))
    ln = (ctx - mu) / (sigma + 1e-3)
    ln = ln * params['gamma'] + params['beta']
    return jnp.maximum(ln, 0.0)


if __name__ == "__main__":
    B, S, H = 2, 64, 32
    key = jax.random.PRNGKey(0)
    k_x, k_adj, k_w, k_b, k_wl, k_wr, k_g, k_bt = jax.random.split(key, 8)

    hidden_state = jax.random.normal(k_x, (B, S, H), dtype=jnp.float32)
    # binary adjacency with self loops
    rand = jax.random.uniform(k_adj, (B, S, S))
    adjacency = (rand > 0.5).astype(jnp.float32)
    adjacency = jnp.maximum(adjacency, jnp.eye(S, dtype=jnp.float32)[None])
    # ship adjacency at 1 byte/element: binary values are exact in int8
    adjacency_i8 = adjacency.astype(jnp.int8)

    params = {
        'W': jax.random.normal(k_w, (H, H), dtype=jnp.float32) * 0.1,
        'b': jax.random.normal(k_b, (H,), dtype=jnp.float32) * 0.1,
        'WL': jax.random.normal(k_wl, (H, H), dtype=jnp.float32) * 0.1,
        'WR': jax.random.normal(k_wr, (H, H), dtype=jnp.float32) * 0.1,
        'gamma': 1.0 + 0.1 * jax.random.normal(k_g, (H,), dtype=jnp.float32),
        'beta': 0.1 * jax.random.normal(k_bt, (H,), dtype=jnp.float32),
    }

    # bf16 MXU operands (h, delta) => looser tolerance vs the f32 reference
    tol = dict(rtol=5e-2, atol=5e-2)

    # default module construction: use_weight=False (auto-tiled)
    out_plain = jax.block_until_ready(
        gcn_layer(hidden_state, adjacency_i8, params, use_weight=False))
    ref_plain = ref_forward(hidden_state, adjacency, params, use_weight=False)
    np.testing.assert_allclose(np.asarray(out_plain), np.asarray(ref_plain), **tol)

    # row-tiled plain path (code-path coverage at toy shape; the auto-tiler
    # floors ts at 128/256 in production)
    out_plain_rt = jax.block_until_ready(
        gcn_layer(hidden_state, adjacency_i8, params, use_weight=False,
                  batch_block=1, row_tile=32))
    np.testing.assert_allclose(np.asarray(out_plain_rt), np.asarray(ref_plain),
                               **tol)

    # bf16 output writeback option
    out_plain_bf16 = jax.block_until_ready(
        gcn_layer(hidden_state, adjacency_i8, params, use_weight=False,
                  out_dtype=jnp.bfloat16))
    np.testing.assert_allclose(np.asarray(out_plain_bf16, dtype=np.float32),
                               np.asarray(ref_plain), **tol)

    # use_weight=True branch (auto-tiled)
    out_w = jax.block_until_ready(
        gcn_layer(hidden_state, adjacency_i8, params, use_weight=True))
    ref_w = ref_forward(hidden_state, adjacency, params, use_weight=True)
    np.testing.assert_allclose(np.asarray(out_w), np.asarray(ref_w), **tol)

    # row-tiled weighted path (new: adj^T precomputed, fused triangular mask)
    out_w_rt = jax.block_until_ready(
        gcn_layer(hidden_state, adjacency_i8, params, use_weight=True,
                  batch_block=1, row_tile=32))
    np.testing.assert_allclose(np.asarray(out_w_rt), np.asarray(ref_w), **tol)

    print("KERNEL_OK")
</pallas_src>

<mosaic_0001>
module attributes {stable_mosaic.version = 11 : i64} {
  func.func @_gcn_kernel_plain(%arg0: i32, %arg1: i32, %arg2: memref<2x64x32xf32, #tpu.memory_space<vmem>>, %arg3: memref<2x64x64xi8, #tpu.memory_space<vmem>>, %arg4: memref<32x128xbf16, #tpu.memory_space<vmem>>, %arg5: memref<1x128xf32, #tpu.memory_space<vmem>>, %arg6: memref<1x128xf32, #tpu.memory_space<vmem>>, %arg7: memref<1x128xf32, #tpu.memory_space<vmem>>, %arg8: memref<2x64x128xf32, #tpu.memory_space<vmem>>, %arg9: memref<2x64x128xbf16, #tpu.memory_space<vmem>>) attributes {dimension_semantics = [#tpu.dimension_semantics<parallel>, #tpu.dimension_semantics<arbitrary>], iteration_bounds = array<i64: 1, 1>, scalar_prefetch = 0 : i64, scratch_operands = 1 : i64, tpu.core_type = #tpu.core_type<tc>, window_params = [{transform_indices = @transform_0, window_bounds = array<i64: 2, 64, 32>}, {transform_indices = @transform_1, window_bounds = array<i64: 2, 64, 64>}, {pipeline_mode = #tpu.pipeline_mode<synchronous>, transform_indices = @transform_2, window_bounds = array<i64: 32, 128>}, {pipeline_mode = #tpu.pipeline_mode<synchronous>, transform_indices = @transform_3, window_bounds = array<i64: 1, 128>}, {pipeline_mode = #tpu.pipeline_mode<synchronous>, transform_indices = @transform_4, window_bounds = array<i64: 1, 128>}, {pipeline_mode = #tpu.pipeline_mode<synchronous>, transform_indices = @transform_5, window_bounds = array<i64: 1, 128>}, {transform_indices = @transform_6, window_bounds = array<i64: 2, 64, 128>}]} {
    %c0_i32 = arith.constant 0 : i32
    %0 = arith.cmpi eq, %arg1, %c0_i32 : i32
    %1 = arith.extui %0 : i1 to i32
    %c0_i32_0 = arith.constant 0 : i32
    %2 = arith.cmpi ne, %1, %c0_i32_0 : i32
    scf.if %2 {
      %c0_23 = arith.constant 0 : index
      %c0_24 = arith.constant 0 : index
      %c0_25 = arith.constant 0 : index
      %52 = vector.load %arg2[%c0_23, %c0_24, %c0_25] : memref<2x64x32xf32, #tpu.memory_space<vmem>>, vector<2x64x32xf32>
      %53 = vector.shape_cast %52 : vector<2x64x32xf32> to vector<128x32xf32>
      %54 = arith.truncf %53 : vector<128x32xf32> to vector<128x32xbf16>
      %c0_26 = arith.constant 0 : index
      %c0_27 = arith.constant 0 : index
      %55 = vector.load %arg4[%c0_26, %c0_27] : memref<32x128xbf16, #tpu.memory_space<vmem>>, vector<32x128xbf16>
      %cst_28 = arith.constant dense<0.000000e+00> : vector<128x128xf32>
      %56 = tpu.matmul %54, %55, %cst_28 {dimension_numbers = #tpu.dot_dimension_numbers<[1], [0], [0], [1], [0, 0, 1, 1], [], []>} : vector<128x32xbf16>, vector<32x128xbf16>, vector<128x128xf32> -> vector<128x128xf32>
      %c0_29 = arith.constant 0 : index
      %c0_30 = arith.constant 0 : index
      %57 = vector.load %arg5[%c0_29, %c0_30] : memref<1x128xf32, #tpu.memory_space<vmem>>, vector<1x128xf32>
      %58 = vector.broadcast %57 : vector<1x128xf32> to vector<128x128xf32>
      %59 = arith.addf %56, %58 : vector<128x128xf32>
      %60 = vector.shape_cast %59 : vector<128x128xf32> to vector<2x64x128xf32>
      %61 = arith.truncf %60 : vector<2x64x128xf32> to vector<2x64x128xbf16>
      %c0_31 = arith.constant 0 : index
      %c0_32 = arith.constant 0 : index
      %c0_33 = arith.constant 0 : index
      %62 = vector.load %arg9[%c0_31, %c0_32, %c0_33] : memref<2x64x128xbf16, #tpu.memory_space<vmem>>, vector<2x64x128xbf16>
      tpu.vector_store %arg9[%c0_31, %c0_32, %c0_33], %61 {strides = array<i32>} : memref<2x64x128xbf16, #tpu.memory_space<vmem>>, vector<2x64x128xbf16>,
    } else {
    }
    %c0 = arith.constant 0 : index
    %c0_1 = arith.constant 0 : index
    %c0_2 = arith.constant 0 : index
    %3 = vector.load %arg3[%c0, %c0_1, %c0_2] : memref<2x64x64xi8, #tpu.memory_space<vmem>>, vector<2x64x64xi8>
    %4 = arith.sitofp %3 : vector<2x64x64xi8> to vector<2x64x64xf32>
    %cst = arith.constant dense<0.000000e+00> : vector<2x64xf32>
    %5 = vector.multi_reduction <add>, %4, %cst [2] : vector<2x64x64xf32> to vector<2x64xf32>
    %6 = vector.shape_cast %5 : vector<2x64xf32> to vector<2x64x1xf32>
    %7 = arith.truncf %4 : vector<2x64x64xf32> to vector<2x64x64xbf16>
    %c0_3 = arith.constant 0 : index
    %c0_4 = arith.constant 0 : index
    %c0_5 = arith.constant 0 : index
    %8 = vector.load %arg9[%c0_3, %c0_4, %c0_5] : memref<2x64x128xbf16, #tpu.memory_space<vmem>>, vector<2x64x128xbf16>
    "tpu.trace_start"() <{level = 10 : i32, message = "bts,bsh->bth"}> : () -> ()
    %cst_6 = arith.constant dense<0.000000e+00> : vector<2x64x128xf32>
    %9 = tpu.matmul %7, %8, %cst_6 {dimension_numbers = #tpu.dot_dimension_numbers<[2], [1], [1], [2], [0, 0, 0, 1, 1, 2], [0], [0]>} : vector<2x64x64xbf16>, vector<2x64x128xbf16>, vector<2x64x128xf32> -> vector<2x64x128xf32>
    "tpu.trace_stop"() : () -> ()
    %cst_7 = arith.constant 1.000000e-10 : f32
    %10 = vector.broadcast %cst_7 : f32 to vector<2x64x1xf32>
    %11 = arith.addf %6, %10 : vector<2x64x1xf32>
    %cst_8 = arith.constant 1.000000e+00 : f32
    %12 = vector.broadcast %cst_8 : f32 to vector<2x64x1xf32>
    %13 = arith.divf %12, %11 : vector<2x64x1xf32>
    %14 = vector.broadcast %13 : vector<2x64x1xf32> to vector<2x64x128xf32>
    %15 = arith.mulf %9, %14 : vector<2x64x128xf32>
    %c0_9 = arith.constant 0 : index
    %c0_10 = arith.constant 0 : index
    %16 = vector.load %arg6[%c0_9, %c0_10] : memref<1x128xf32, #tpu.memory_space<vmem>>, vector<1x128xf32>
    %c0_11 = arith.constant 0 : index
    %c0_12 = arith.constant 0 : index
    %17 = vector.load %arg7[%c0_11, %c0_12] : memref<1x128xf32, #tpu.memory_space<vmem>>, vector<1x128xf32>
    %18 = tpu.iota {dimensions = array<i32: 2>} : vector<1x1x128xi32>
    %c32_i32 = arith.constant 32 : i32
    %19 = vector.broadcast %c32_i32 : i32 to vector<1x1x128xi32>
    %20 = arith.cmpi slt, %18, %19 : vector<1x1x128xi32>
    %21 = arith.extui %20 : vector<1x1x128xi1> to vector<1x1x128xi32>
    %22 = arith.sitofp %21 : vector<1x1x128xi32> to vector<1x1x128xf32>
    %23 = vector.shape_cast %16 : vector<1x128xf32> to vector<1x1x128xf32>
    %24 = vector.shape_cast %17 : vector<1x128xf32> to vector<1x1x128xf32>
    %cst_13 = arith.constant dense<0.000000e+00> : vector<2x64xf32>
    %25 = vector.multi_reduction <add>, %15, %cst_13 [2] : vector<2x64x128xf32> to vector<2x64xf32>
    %26 = vector.shape_cast %25 : vector<2x64xf32> to vector<2x64x1xf32>
    %cst_14 = arith.constant 3.125000e-02 : f32
    %27 = vector.broadcast %cst_14 : f32 to vector<2x64x1xf32>
    %28 = arith.mulf %26, %27 : vector<2x64x1xf32>
    %29 = vector.broadcast %28 : vector<2x64x1xf32> to vector<2x64x128xf32>
    %30 = arith.subf %15, %29 : vector<2x64x128xf32>
    %31 = vector.broadcast %22 : vector<1x1x128xf32> to vector<2x64x128xf32>
    %32 = arith.mulf %30, %31 : vector<2x64x128xf32>
    %33 = arith.mulf %32, %32 : vector<2x64x128xf32>
    %cst_15 = arith.constant dense<0.000000e+00> : vector<2x64xf32>
    %34 = vector.multi_reduction <add>, %33, %cst_15 [2] : vector<2x64x128xf32> to vector<2x64xf32>
    %35 = vector.shape_cast %34 : vector<2x64xf32> to vector<2x64x1xf32>
    %cst_16 = arith.constant 0.0322580636 : f32
    %36 = vector.broadcast %cst_16 : f32 to vector<2x64x1xf32>
    %37 = arith.mulf %35, %36 : vector<2x64x1xf32>
    %38 = math.sqrt %37 : vector<2x64x1xf32>
    %cst_17 = arith.constant 1.000000e-03 : f32
    %39 = vector.broadcast %cst_17 : f32 to vector<2x64x1xf32>
    %40 = arith.addf %38, %39 : vector<2x64x1xf32>
    %cst_18 = arith.constant 1.000000e+00 : f32
    %41 = vector.broadcast %cst_18 : f32 to vector<2x64x1xf32>
    %42 = arith.divf %41, %40 : vector<2x64x1xf32>
    %43 = vector.broadcast %42 : vector<2x64x1xf32> to vector<2x64x128xf32>
    %44 = arith.mulf %30, %43 : vector<2x64x128xf32>
    %45 = vector.broadcast %23 : vector<1x1x128xf32> to vector<2x64x128xf32>
    %46 = arith.mulf %44, %45 : vector<2x64x128xf32>
    %47 = vector.broadcast %24 : vector<1x1x128xf32> to vector<2x64x128xf32>
    %48 = arith.addf %46, %47 : vector<2x64x128xf32>
    %cst_19 = arith.constant 0.000000e+00 : f32
    %49 = vector.broadcast %cst_19 : f32 to vector<2x64x128xf32>
    %50 = arith.maximumf %48, %49 : vector<2x64x128xf32>
    %c0_20 = arith.constant 0 : index
    %c0_21 = arith.constant 0 : index
    %c0_22 = arith.constant 0 : index
    %51 = vector.load %arg8[%c0_20, %c0_21, %c0_22] : memref<2x64x128xf32, #tpu.memory_space<vmem>>, vector<2x64x128xf32>
    tpu.vector_store %arg8[%c0_20, %c0_21, %c0_22], %50 {strides = array<i32>} : memref<2x64x128xf32, #tpu.memory_space<vmem>>, vector<2x64x128xf32>,
    return
  }
  func.func @transform_0(%arg0: i32, %arg1: i32) -> (i32, i32, i32) {
    %c0_i32 = arith.constant 0 : i32
    %c0_i32_0 = arith.constant 0 : i32
    %c0_i32_1 = arith.constant 0 : i32
    return %arg0, %c0_i32, %c0_i32_0 : i32, i32, i32
  }
  func.func @transform_1(%arg0: i32, %arg1: i32) -> (i32, i32, i32) {
    %c0_i32 = arith.constant 0 : i32
    %c0_i32_0 = arith.constant 0 : i32
    return %arg0, %arg1, %c0_i32 : i32, i32, i32
  }
  func.func @transform_2(%arg0: i32, %arg1: i32) -> (i32, i32) {
    %c0_i32 = arith.constant 0 : i32
    %c0_i32_0 = arith.constant 0 : i32
    %c0_i32_1 = arith.constant 0 : i32
    return %c0_i32, %c0_i32_0 : i32, i32
  }
  func.func @transform_3(%arg0: i32, %arg1: i32) -> (i32, i32) {
    %c0_i32 = arith.constant 0 : i32
    %c0_i32_0 = arith.constant 0 : i32
    %c0_i32_1 = arith.constant 0 : i32
    return %c0_i32, %c0_i32_0 : i32, i32
  }
  func.func @transform_4(%arg0: i32, %arg1: i32) -> (i32, i32) {
    %c0_i32 = arith.constant 0 : i32
    %c0_i32_0 = arith.constant 0 : i32
    %c0_i32_1 = arith.constant 0 : i32
    return %c0_i32, %c0_i32_0 : i32, i32
  }
  func.func @transform_5(%arg0: i32, %arg1: i32) -> (i32, i32) {
    %c0_i32 = arith.constant 0 : i32
    %c0_i32_0 = arith.constant 0 : i32
    %c0_i32_1 = arith.constant 0 : i32
    return %c0_i32, %c0_i32_0 : i32, i32
  }
  func.func @transform_6(%arg0: i32, %arg1: i32) -> (i32, i32, i32) {
    %c0_i32 = arith.constant 0 : i32
    %c0_i32_0 = arith.constant 0 : i32
    return %arg0, %arg1, %c0_i32 : i32, i32, i32
  }
}

</mosaic_0001>

<bundles_post_ra>
// kernel: tpu_custom_call.1
= control target key start
LH: loop header
LB: loop body
LE: loop exit
PB: predicated region body
PF: predicated region fallthrough
CT: control target
= control target key end

     0   :  { %11 = vsyncpa [#allocation4], 0  ;;  %s1949_s0 = inlined_call_operand.hbm [shape: f32[2,64,32], index: 0, kind: input, shape index: {}]   ;;  %s1950_s1 = inlined_call_operand.hbm [shape: s8[2,64,64], index: 1, kind: input, shape index: {}]   ;;  %s1951_s2 = inlined_call_operand.hbm [shape: bf16[32,128], index: 2, kind: input, shape index: {}]   ;;  %s1952_s3 = inlined_call_operand.hbm [shape: f32[1,128], index: 3, kind: input, shape index: {}]   ;;  %s1953_s4 = inlined_call_operand.hbm [shape: f32[1,128], index: 4, kind: input, shape index: {}]   ;;  %s1954_s5 = inlined_call_operand.hbm [shape: f32[1,128], index: 5, kind: input, shape index: {}]   ;;  %s1955_s6 = inlined_call_operand.hbm [shape: f32[2,64,128], index: 6, kind: output, shape index: {}]  }
   0x1   :  { %12 = vsyncpa [#allocation7], 0 }
   0x2   :  { %13 = vsyncpa [#allocation10], 0 }
   0x3   :  { %14 = vsyncpa [#allocation13], 0 }
   0x4   :  { %15 = vsyncpa [#allocation5], 0  ;;  %s1406_s21 = smov [#allocation6]   ;;  %s1407_s23 = smov [#allocation9]  }
   0x5   :  { %s33_s22 = sshll.u32 %s1406_s21, 4  ;;  %s58_s24 = sshll.u32 %s1407_s23, 4  ;;  %s34_s22 = int_to_ptr.vmem [resolvable:$true] %s33_s22  ;;  %s1453_s24 = int_to_ptr.vmem [resolvable:$true] %s58_s24 }
   0x6   :  { %s1242_s27 = scalar_lea.hbm %s1950_s1, 512 }
   0x7   :  { %p1243_p0 = scmp.ne.s32.totalorder %s1950_s1, %s1242_s27  ;;  %p1246_p1 = scmp.lt.u32.totalorder %s1242_s27, %s1950_s1 }
   0x9   :  { %p1248_p2 = pnand %p1246_p1, %p1243_p0 }
   0xb   :  { %1251 = shalt.err (!%p1248_p2)
}
   0xc   :  { %s1252_s8 = scalar_lea.vmem %s34_s22, 512  ;;  %p1257_p4 = scmp.lt.s32.totalorder %s34_s22, %s34_s22 }
   0xd   :  { %p1253_p3 = scmp.ne.s32.totalorder %s34_s22, %s1252_s8  ;;  %p1258_p5 = scmp.lt.s32.totalorder %s1252_s8, %s1252_s8 }
   0xf   :  { %p1259_p6 = por %p1258_p5, %p1257_p4 }
  0x11   :  { %p1260_p7 = pnand %p1259_p6, %p1253_p3 }
  0x13   :  { %1263 = shalt.err (!%p1260_p7)
}
  0x14   :  { %s1408_s9 = smov 128   ;;  %s1409_s10 = smov 8  }
  0x15   :  { %39 = dma.hbm_to_vmem [thread:$0]  %s1950_s1, 512, %s34_s22, [#allocation7], %s1408_s9, %s1408_s9, %s1409_s10  }
  0x16   :  { %s1264_s15 = scalar_lea.hbm %s1952_s3, 16 }
  0x17   :  { %p1265_p8 = scmp.ne.s32.totalorder %s1952_s3, %s1264_s15  ;;  %p1268_p9 = scmp.lt.u32.totalorder %s1264_s15, %s1952_s3 }
  0x19   :  { %p1270_p10 = pnand %p1268_p9, %p1265_p8 }
  0x1b   :  { %1273 = shalt.err (!%p1270_p10)
}
  0x1c   :  { %s1274_s20 = scalar_lea.vmem %s1453_s24, 16  ;;  %s1278_s1 = scalar_lea.vmem %s1453_s24, 32 }
  0x1d   :  { %p1275_p11 = scmp.ne.s32.totalorder %s1453_s24, %s1274_s20  ;;  %p1279_p12 = scmp.lt.s32.totalorder %s1453_s24, %s1453_s24 }
  0x1e   :  { %p1280_p13 = scmp.lt.s32.totalorder %s1278_s1, %s1274_s20 }
  0x20   :  { %p1281_p0 = por %p1280_p13, %p1279_p12 }
  0x22   :  { %p1282_p1 = pnand %p1281_p0, %p1275_p11 }
  0x24   :  { %1285 = shalt.err (!%p1282_p1)
}
  0x25   :  { %61 = dma.hbm_to_vmem [thread:$0]  %s1952_s3, 16, %s1453_s24, [#allocation10]  }
  0x26   :  { %s1410_s23 = smov [#allocation3]   ;;  %s1411_s26 = smov [#allocation8]  }
  0x27   :  { %s21_s25 = sshll.u32 %s1410_s23, 4  ;;  %s45_s27 = sshll.u32 %s1411_s26, 4  ;;  %s22_s25 = int_to_ptr.vmem [resolvable:$true] %s21_s25  ;;  %s1488_s27 = int_to_ptr.vmem [resolvable:$true] %s45_s27 }
  0x28   :  { %s1286_s30 = scalar_lea.hbm %s1949_s0, 2048 }
  0x29   :  { %p1287_p2 = scmp.ne.s32.totalorder %s1949_s0, %s1286_s30  ;;  %p1290_p3 = scmp.lt.u32.totalorder %s1286_s30, %s1949_s0 }
  0x2b   :  { %p1292_p4 = pnand %p1290_p3, %p1287_p2 }
  0x2d   :  { %1295 = shalt.err (!%p1292_p4)
}
  0x2e   :  { %s1296_s3 = scalar_lea.vmem %s22_s25, 2048  ;;  %p1301_p6 = scmp.lt.s32.totalorder %s22_s25, %s22_s25 }
  0x2f   :  { %p1297_p5 = scmp.ne.s32.totalorder %s22_s25, %s1296_s3  ;;  %p1302_p7 = scmp.lt.s32.totalorder %s1296_s3, %s1296_s3 }
  0x31   :  { %p1303_p8 = por %p1302_p7, %p1301_p6 }
  0x33   :  { %p1304_p9 = pnand %p1303_p8, %p1297_p5 }
  0x35   :  { %1307 = shalt.err (!%p1304_p9)
}
  0x36   :  { %27 = dma.hbm_to_vmem [thread:$0]  %s1949_s0, 2048, %s22_s25, [#allocation4], %s1408_s9, %s1408_s9, %s1409_s10  }
  0x37   :  { %s1308_s16 = scalar_lea.hbm %s1951_s2, 256 }
  0x38   :  { %p1309_p10 = scmp.ne.s32.totalorder %s1951_s2, %s1308_s16  ;;  %p1312_p11 = scmp.lt.u32.totalorder %s1308_s16, %s1951_s2 }
  0x3a   :  { %p1314_p12 = pnand %p1312_p11, %p1309_p10 }
  0x3c   :  { %1317 = shalt.err (!%p1314_p12)
}
  0x3d   :  { %s1318_s1 = scalar_lea.vmem %s1488_s27, 256  ;;  %p1323_p0 = scmp.lt.s32.totalorder %s1488_s27, %s1488_s27 }
  0x3e   :  { %p1319_p13 = scmp.ne.s32.totalorder %s1488_s27, %s1318_s1  ;;  %p1324_p1 = scmp.lt.s32.totalorder %s1318_s1, %s1318_s1 }
  0x40   :  { %p1325_p2 = por %p1324_p1, %p1323_p0 }
  0x42   :  { %p1326_p3 = pnand %p1325_p2, %p1319_p13 }
  0x44   :  { %1329 = shalt.err (!%p1326_p3)
}
  0x45   :  { %s1412_s0 = smov 64   ;;  %s1413_s21 = smov 4  }
  0x46   :  { %51 = dma.hbm_to_vmem [thread:$0]  %s1951_s2, 256, %s1488_s27, [#allocation7], %s1412_s0, %s1412_s0, %s1413_s21  }
  0x47   :  { %s1414_s25 = smov [#allocation11]   ;;  %s1415_s28 = smov [#allocation12]  }
  0x48   :  { %s68_s26 = sshll.u32 %s1414_s25, 4  ;;  %s78_s29 = sshll.u32 %s1415_s28, 4  ;;  %s69_s26 = int_to_ptr.vmem [resolvable:$true] %s68_s26  ;;  %s79_s29 = int_to_ptr.vmem [resolvable:$true] %s78_s29 }
  0x49   :  { %s1330_s8 = scalar_lea.hbm %s1953_s4, 16 }
  0x4a   :  { %p1331_p4 = scmp.ne.s32.totalorder %s1953_s4, %s1330_s8  ;;  %p1334_p5 = scmp.lt.u32.totalorder %s1330_s8, %s1953_s4 }
  0x4c   :  { %p1336_p6 = pnand %p1334_p5, %p1331_p4 }
  0x4e   :  { %1339 = shalt.err (!%p1336_p6)
}
  0x4f   :  { %s1340_s2 = scalar_lea.vmem %s69_s26, 16  ;;  %s1344_s27 = scalar_lea.vmem %s69_s26, 32 }
  0x50   :  { %p1341_p7 = scmp.ne.s32.totalorder %s69_s26, %s1340_s2  ;;  %p1345_p8 = scmp.lt.s32.totalorder %s69_s26, %s69_s26 }
  0x51   :  { %p1346_p9 = scmp.lt.s32.totalorder %s1344_s27, %s1340_s2 }
  0x53   :  { %p1347_p10 = por %p1346_p9, %p1345_p8 }
  0x55   :  { %p1348_p11 = pnand %p1347_p10, %p1341_p7 }
  0x57   :  { %1351 = shalt.err (!%p1348_p11)
}
  0x58   :  { %71 = dma.hbm_to_vmem [thread:$0]  %s1953_s4, 16, %s69_s26, [#allocation10]  }
  0x59   :  { %s1352_s17 = scalar_lea.hbm %s1954_s5, 16 }
  0x5a   :  { %p1353_p12 = scmp.ne.s32.totalorder %s1954_s5, %s1352_s17  ;;  %p1356_p13 = scmp.lt.u32.totalorder %s1352_s17, %s1954_s5 }
  0x5c   :  { %p1358_p0 = pnand %p1356_p13, %p1353_p12 }
  0x5e   :  { %1361 = shalt.err (!%p1358_p0)
}
  0x5f   :  { %s1362_s0 = scalar_lea.vmem %s79_s29, 16  ;;  %s1366_s21 = scalar_lea.vmem %s79_s29, 32 }
  0x60   :  { %p1363_p1 = scmp.ne.s32.totalorder %s79_s29, %s1362_s0  ;;  %p1367_p2 = scmp.lt.s32.totalorder %s79_s29, %s79_s29 }
  0x61   :  { %p1368_p3 = scmp.lt.s32.totalorder %s1366_s21, %s1362_s0 }
  0x63   :  { %p1369_p4 = por %p1368_p3, %p1367_p2 }
  0x65   :  { %p1370_p5 = pnand %p1369_p4, %p1363_p1 }
  0x67   :  { %1373 = shalt.err (!%p1370_p5)
}
  0x68   :  { %81 = dma.hbm_to_vmem [thread:$0]  %s1954_s5, 16, %s79_s29, [#allocation13]  }
  0x69   :  { %1396 = dma.done.wait [#allocation4], 2048  }
  0x6a   :  { %1397 = vsyncadd [#allocation4], 4294965248 }
  0x6b   :  { %1398 = dma.done.wait [#allocation7], 768  }
  0x6c   :  { %1399 = vsyncadd [#allocation7], 4294966528 }
  0x6d   :  { %1400 = dma.done.wait [#allocation10], 32  }
  0x6e   :  { %1401 = vsyncadd [#allocation10], 4294967264 }
  0x6f   :  { %1402 = dma.done.wait [#allocation13], 16  }
  0x70   :  { %1403 = vsyncadd [#allocation13], 4294967280  ;;  %v1144_v0 = vld [vmem:[#allocation8] sm:$0xff]   ;;  %v1145_v1 = vld [vmem:[#allocation8 + $0x8] sm:$0xff]   ;;  %vm152_vm0 = vcmask 261120   ;;  %vm326_vm1 = vcmask 523264  }
  0x71   :  { %1080 = vmatprep.subr.bf16.mxu0 %v1144_v0  ;;  %v105_v2 = vld [vmem:[#allocation3] sm:$0xff]  ;;  %v106_v3 = vld [vmem:[#allocation3 + $0x8] sm:$0xff]  ;;  %v107_v5 = vld [vmem:[#allocation3 + $0x10] sm:$0xff]  ;;  %s1417_s5 = smov [#allocation14]  }
  0x72   :  { %1081 = vmatpush3.bf16.msra.mxu0 %v1144_v0  ;;  %v121_v4 = vpack.c.bf16 %v106_v3, %v105_v2  ;;  %v108_v6 = vld [vmem:[#allocation3 + $0x18] sm:$0xff]  ;;  %v109_v7 = vld [vmem:[#allocation3 + $0x20] sm:$0xff]  ;;  %v110_v8 = vld [vmem:[#allocation3 + $0x28] sm:$0xff]  ;;  %s1017_s23 = sshll.u32 %s1417_s5, 4  ;;  %s1018_s23 = int_to_ptr.vmem [resolvable:$true] %s1017_s23 }
  0x73   :  { %1082 = vmatprep.subr.bf16.mxu0 %v1145_v1  ;;  %v122_v9 = vpack.c.bf16 %v108_v6, %v107_v5  ;;  %v123_v10 = vpack.c.bf16 %v110_v8, %v109_v7  ;;  %v111_v11 = vld [vmem:[#allocation3 + $0x30] sm:$0xff]  ;;  %v112_v12 = vld [vmem:[#allocation3 + $0x38] sm:$0xff]  ;;  %v113_v13 = vld [vmem:[#allocation3 + $0x40] sm:$0xff]  ;;  %s1374_s25 = scalar_lea.vmem %s1018_s23, 2048  ;;  %p1379_p7 = scmp.lt.s32.totalorder %s1018_s23, %s1018_s23 }
  0x74   :  { %1084 = vmatprep.mubr.msk.bf16.mxu0 %vm152_vm0, %v121_v4  ;;  %v114_v14 = vld [vmem:[#allocation3 + $0x48] sm:$0xff]  ;;  %v124_v15 = vpack.c.bf16 %v112_v12, %v111_v11  ;;  %v115_v17 = vld [vmem:[#allocation3 + $0x50] sm:$0xff]  ;;  %v116_v18 = vld [vmem:[#allocation3 + $0x58] sm:$0xff]  ;;  %p1375_p6 = scmp.ne.s32.totalorder %s1018_s23, %s1374_s25  ;;  %p1380_p8 = scmp.lt.s32.totalorder %s1374_s25, %s1374_s25 }
  0x75   :  { %v125_v16 = vpack.c.bf16 %v114_v14, %v113_v13  ;;  %v117_v19 = vld [vmem:[#allocation3 + $0x60] sm:$0xff]  ;;  %v118_v20 = vld [vmem:[#allocation3 + $0x68] sm:$0xff]  ;;  %v126_v21 = vpack.c.bf16 %v116_v18, %v115_v17  ;;  %v119_v23 = vld [vmem:[#allocation3 + $0x70] sm:$0xff] }
  0x76   :  { %1083 = vmatpush3.bf16.msra.mxu0 %v1145_v1  ;;  %v127_v22 = vpack.c.bf16 %v118_v20, %v117_v19  ;;  %v120_v24 = vld [vmem:[#allocation3 + $0x78] sm:$0xff]  ;;  %v1554_v26 = vld [vmem:[#allocation6] sm:$0xff]  ;;  %v1558_v28 = vld [vmem:[#allocation6 + $0x8] sm:$0xff]  ;;  %p1381_p9 = por %p1380_p8, %p1379_p7 }
  0x77   :  { %v128_v25 = vpack.c.bf16 %v120_v24, %v119_v23  ;;  %v375_v27 = vunpack.c.l.s8.bf16 %v1554_v26  ;;  %v294_v29 = vunpack.c.0.s8 %v1554_v26  ;;  %v296_v30 = vunpack.c.2.s8 %v1554_v26  ;;  %v1572_v47 = vld [vmem:[#allocation6 + $0x10] sm:$0xff]  ;;  %v1582_v60 = vld [vmem:[#allocation6 + $0x18] sm:$0xff] }
  0x78   :  { %v295_v31 = vunpack.c.1.s8 %v1554_v26  ;;  %v297_v32 = vunpack.c.3.s8 %v1554_v26  ;;  %v298_v33 = vunpack.c.0.s8 %v1558_v28  ;;  %v299_v34 = vunpack.c.1.s8 %v1558_v28  ;;  %p1382_p10 = pnand %p1381_p9, %p1375_p6 }
  0x79   :  { %1085 = vmatmul.mubr.msk.bf16.vlgmr.msra.gmra.mrb[0].mxu0 %vm152_vm0, %v122_v9  ;;  %1108 = vmatprep.mubr.msk.bf16.mxu1 %vm326_vm1, %v375_v27  ;;  %v310_v35 = vcvt.s32.f32 %v294_v29  ;;  %v312_v36 = vcvt.s32.f32 %v296_v30  ;;  %v300_v41 = vunpack.c.2.s8 %v1558_v28  ;;  %v301_v42 = vunpack.c.3.s8 %v1558_v28 }
  0x7a   :  { %1088 = vmatprep.mubr.msk.bf16.mxu0 %vm152_vm0, %v123_v10  ;;  %v311_v37 = vcvt.s32.f32 %v295_v31  ;;  %v313_v38 = vcvt.s32.f32 %v297_v32  ;;  %v314_v45 = vcvt.s32.f32 %v298_v33  ;;  %v315_v46 = vcvt.s32.f32 %v299_v34 }
  0x7b   :  { %v327_v39 = vsel %vm326_vm1, %v310_v35, 0.0  ;;  %v333_v40 = vsel %vm326_vm1, %v312_v36, 0.0  ;;  %v316_v48 = vcvt.s32.f32 %v300_v41  ;;  %v317_v49 = vcvt.s32.f32 %v301_v42 }
  0x7c   :  { %328 = vadd.xlane.f32.xlu0 %v327_v39  ;;  %334 = vadd.xlane.f32.xlu1 %v333_v40  ;;  %v330_v43 = vsel %vm326_vm1, %v311_v37, 0.0  ;;  %v336_v44 = vsel %vm326_vm1, %v313_v38, 0.0  ;;  %v339_v50 = vsel %vm326_vm1, %v314_v45, 0.0  ;;  %v342_v51 = vsel %vm326_vm1, %v315_v46, 0.0 }
  0x7d   :  { %v302_v52 = vunpack.c.0.s8 %v1572_v47  ;;  %v303_v53 = vunpack.c.1.s8 %v1572_v47  ;;  %v345_v54 = vsel %vm326_vm1, %v316_v48, 0.0  ;;  %v348_v55 = vsel %vm326_vm1, %v317_v49, 0.0 }
  0x7e   :  { %v304_v58 = vunpack.c.2.s8 %v1572_v47  ;;  %v305_v59 = vunpack.c.3.s8 %v1572_v47  ;;  %v306_v61 = vunpack.c.0.s8 %v1582_v60  ;;  %v307_v62 = vunpack.c.1.s8 %v1582_v60 }
  0x7f   :  { %v318_v56 = vcvt.s32.f32 %v302_v52  ;;  %v319_v57 = vcvt.s32.f32 %v303_v53  ;;  %v308_v3 = vunpack.c.2.s8 %v1582_v60  ;;  %v309_v4 = vunpack.c.3.s8 %v1582_v60 }
  0x80   :  { %331 = vadd.xlane.f32.xlu0 %v330_v43  ;;  %337 = vadd.xlane.f32.xlu1 %v336_v44  ;;  %v320_v1 = vcvt.s32.f32 %v304_v58  ;;  %v321_v2 = vcvt.s32.f32 %v305_v59  ;;  %v322_v7 = vcvt.s32.f32 %v306_v61  ;;  %v323_v8 = vcvt.s32.f32 %v307_v62 }
  0x81   :  { %1089 = vmatmul.mubr.msk.bf16.gmra.mrb[4].mxu0 %vm152_vm0, %v124_v15  ;;  %v351_v63 = vsel %vm326_vm1, %v318_v56, 0.0  ;;  %v354_v0 = vsel %vm326_vm1, %v319_v57, 0.0  ;;  %v324_v11 = vcvt.s32.f32 %v308_v3  ;;  %v325_v12 = vcvt.s32.f32 %v309_v4 }
  0x82   :  { %1092 = vmatprep.mubr.msk.bf16.mxu0 %vm152_vm0, %v125_v16  ;;  %v357_v5 = vsel %vm326_vm1, %v320_v1, 0.0  ;;  %v360_v6 = vsel %vm326_vm1, %v321_v2, 0.0  ;;  %v363_v9 = vsel %vm326_vm1, %v322_v7, 0.0  ;;  %v366_v10 = vsel %vm326_vm1, %v323_v8, 0.0  ;;  %v1032_v16 = vld [vmem:[#allocation9] ss:$0 sm:$0xff] }
  0x83   :  { %v369_v13 = vsel %vm326_vm1, %v324_v11, 0.0  ;;  %v372_v14 = vsel %vm326_vm1, %v325_v12, 0.0  ;;  %v376_v46 = vunpack.c.h.s8.bf16 %v1554_v26  ;;  %v377_v49 = vunpack.c.l.s8.bf16 %v1558_v28 }
  0x84   :  { %340 = vadd.xlane.f32.xlu0 %v339_v50  ;;  %343 = vadd.xlane.f32.xlu1 %v342_v51  ;;  %v378_v58 = vunpack.c.h.s8.bf16 %v1558_v28  ;;  %v379_v61 = vunpack.c.l.s8.bf16 %v1572_v47  ;;  %v382_v28 = vunpack.c.h.s8.bf16 %v1582_v60 }
  0x88   :  { %346 = vadd.xlane.f32.xlu0 %v345_v54  ;;  %349 = vadd.xlane.f32.xlu1 %v348_v55 }
  0x89   :  { %1093 = vmatmul.mubr.msk.bf16.gmra.mrb[8].mxu0 %vm152_vm0, %v126_v21 }
  0x8a   :  { %1096 = vmatprep.mubr.msk.bf16.mxu0 %vm152_vm0, %v127_v22 }
  0x8c   :  { %352 = vadd.xlane.f32.xlu0 %v351_v63  ;;  %355 = vadd.xlane.f32.xlu1 %v354_v0  ;;  %v380_v63 = vunpack.c.h.s8.bf16 %v1572_v47  ;;  %v381_v0 = vunpack.c.l.s8.bf16 %v1582_v60 }
  0x90   :  { %358 = vadd.xlane.f32.xlu0 %v357_v5  ;;  %361 = vadd.xlane.f32.xlu1 %v360_v6 }
  0x91   :  { %1097 = vmatmul.mubr.msk.bf16.gmra.mrb[12].mxu0 %vm152_vm0, %v128_v25 }
  0x94   :  { %364 = vadd.xlane.f32.xlu0 %v363_v9  ;;  %367 = vadd.xlane.f32.xlu1 %v366_v10 }
  0x98   :  { %370 = vadd.xlane.f32.xlu0 %v369_v13  ;;  %373 = vadd.xlane.f32.xlu1 %v372_v14 }
 0x109   :  { %v329_v1 = vpop.xlane.xlu0 %328  ;;  %v335_v2 = vpop.xlane.xlu1 %334 }
 0x10a   :  { %v547_v7 = vadd.f32 1e-10, %v335_v2  ;;  %v545_v10 = vadd.f32 1e-10, %v329_v1 }
 0x10c   :  { %1146 = vrcp.f32 %v547_v7 }
 0x10d   :  { %v332_v3 = vpop.xlane.xlu0 %331  ;;  %v338_v4 = vpop.xlane.xlu1 %337 }
 0x10e   :  { %v548_v47 = vadd.f32 1e-10, %v338_v4  ;;  %v546_v11 = vadd.f32 1e-10, %v332_v3 }
 0x110   :  { %1148 = vrcp.f32 %v548_v47 }
 0x111   :  { %v341_v5 = vpop.xlane.xlu0 %340  ;;  %v344_v6 = vpop.xlane.xlu1 %343  ;;  %1150 = vrcp.f32 %v545_v10 }
 0x112   :  { %1152 = vrcp.f32 %v546_v11 }
 0x115   :  { %v347_v8 = vpop.xlane.xlu0 %346  ;;  %v350_v9 = vpop.xlane.xlu1 %349 }
 0x116   :  { %v551_v13 = vadd.f32 1e-10, %v347_v8  ;;  %v552_v14 = vadd.f32 1e-10, %v350_v9 }
 0x118   :  { %1154 = vrcp.f32 %v551_v13 }
 0x119   :  { %v353_v12 = vpop.xlane.xlu0 %352  ;;  %v356_v60 = vpop.xlane.xlu1 %355  ;;  %1156 = vrcp.f32 %v552_v14 }
 0x14c   :  { %v1086_v15 = vpop.f32.mrb[0].mxu0 }
 0x14d   :  { %v211_v17 = vpop.f32.mrb[1].mxu0  ;;  %v220_v19 = vadd.f32 %v1086_v15, %v1032_v16  ;;  %v359_v15 = vpop.xlane.xlu0 %358 }
 0x14e   :  { %v1087_v18 = vpop.f32.mrb[2].mxu0  ;;  %v212_v22 = vadd.f32 %v1032_v16, %v211_v17  ;;  %v549_v17 = vadd.f32 1e-10, %v341_v5 }
 0x14f   :  { %v223_v20 = vadd.f32 %v1087_v18, %v1032_v16  ;;  %v214_v21 = vpop.f32.mrb[3].mxu0  ;;  %v550_v18 = vadd.f32 1e-10, %v344_v6 }
 0x150   :  { %v215_v23 = vadd.f32 %v1032_v16, %v214_v21  ;;  %1158 = vrcp.f32 %v549_v17 }
 0x151   :  { %v275_v24 = vpack.c.bf16 %v223_v20, %v220_v19  ;;  %v362_v19 = vpop.xlane.xlu1 %361  ;;  %1160 = vrcp.f32 %v550_v18 }
 0x152   :  { %v274_v25 = vpack.c.bf16 %v215_v23, %v212_v22  ;;  %v555_v22 = vadd.f32 1e-10, %v359_v15  ;;  %v611_v15 = vlaneseq }
 0x154   :  { %v1090_v27 = vpop.f32.mrb[4].mxu0  ;;  %1100 = vmatprep.subr.bf16.mxu1 %v274_v25  ;;  %1162 = vrcp.f32 %v555_v22 }
 0x155   :  { %v227_v29 = vpop.f32.mrb[5].mxu0  ;;  %1101 = vmatpush3.bf16.msra.mxu1 %v274_v25  ;;  %v236_v31 = vadd.f32 %v1090_v27, %v1032_v16  ;;  %v556_v27 = vadd.f32 1e-10, %v362_v19 }
 0x156   :  { %v1091_v30 = vpop.f32.mrb[6].mxu0  ;;  %1102 = vmatprep.subr.bf16.mxu1 %v275_v24  ;;  %v228_v34 = vadd.f32 %v1032_v16, %v227_v29 }
 0x157   :  { %v239_v32 = vadd.f32 %v1091_v30, %v1032_v16  ;;  %v230_v33 = vpop.f32.mrb[7].mxu0  ;;  %1164 = vrcp.f32 %v556_v27 }
 0x158   :  { %v231_v35 = vadd.f32 %v1032_v16, %v230_v33  ;;  %v365_v33 = vpop.xlane.xlu0 %364 }
 0x159   :  { %v277_v36 = vpack.c.bf16 %v239_v32, %v236_v31  ;;  %1103 = vmatpush3.bf16.msra.mxu1 %v275_v24 }
 0x15a   :  { %v276_v37 = vpack.c.bf16 %v231_v35, %v228_v34 }
 0x15c   :  { %v1094_v38 = vpop.f32.mrb[8].mxu0  ;;  %1104 = vmatprep.subr.bf16.mxu1 %v276_v37 }
 0x15d   :  { %v243_v39 = vpop.f32.mrb[9].mxu0  ;;  %1105 = vmatpush3.bf16.msra.mxu1 %v276_v37  ;;  %v252_v41 = vadd.f32 %v1094_v38, %v1032_v16  ;;  %v368_v37 = vpop.xlane.xlu1 %367 }
 0x15e   :  { %v1095_v40 = vpop.f32.mrb[10].mxu0  ;;  %1106 = vmatprep.subr.bf16.mxu1 %v277_v36  ;;  %v244_v44 = vadd.f32 %v1032_v16, %v243_v39 }
 0x15f   :  { %v255_v42 = vadd.f32 %v1095_v40, %v1032_v16  ;;  %v246_v43 = vpop.f32.mrb[11].mxu0  ;;  %v554_v40 = vadd.f32 1e-10, %v356_v60 }
 0x160   :  { %v247_v45 = vadd.f32 %v1032_v16, %v246_v43 }
 0x161   :  { %v279_v48 = vpack.c.bf16 %v255_v42, %v252_v41  ;;  %1107 = vmatpush3.bf16.msra.mxu1 %v277_v36  ;;  %v553_v36 = vadd.f32 1e-10, %v353_v12  ;;  %v557_v42 = vadd.f32 1e-10, %v365_v33 }
 0x162   :  { %v278_v50 = vpack.c.bf16 %v247_v45, %v244_v44 }
 0x163   :  { %1166 = vrcp.f32 %v553_v36 }
 0x164   :  { %v1098_v51 = vpop.f32.mrb[12].mxu0  ;;  %1109 = vmatmul.mubr.msk.bf16.vlgmr.msra.gmra.mrb[0].mxu1 %vm326_vm1, %v376_v46  ;;  %1116 = vmatprep.subr.bf16.mxu1 %v278_v50  ;;  %v371_v46 = vpop.xlane.xlu0 %370  ;;  %1168 = vrcp.f32 %v554_v40 }
 0x165   :  { %v259_v52 = vpop.f32.mrb[13].mxu0  ;;  %1117 = vmatpush3.bf16.msra.mxu1 %v278_v50  ;;  %1112 = vmatprep.mubr.msk.bf16.mxu1 %vm326_vm1, %v377_v49  ;;  %v268_v54 = vadd.f32 %v1098_v51, %v1032_v16  ;;  %1170 = vrcp.f32 %v557_v42 }
 0x166   :  { %v1099_v53 = vpop.f32.mrb[14].mxu0  ;;  %1118 = vmatprep.subr.bf16.mxu1 %v279_v48  ;;  %v260_v57 = vadd.f32 %v1032_v16, %v259_v52  ;;  %v374_v52 = vpop.xlane.xlu1 %373 }
 0x167   :  { %v271_v55 = vadd.f32 %v1099_v53, %v1032_v16  ;;  %v262_v56 = vpop.f32.mrb[15].mxu0 }
 0x168   :  { %v263_v26 = vadd.f32 %v1032_v16, %v262_v56  ;;  %v1147_v16 = vpop.eup %1146 }
 0x169   :  { %v281_v59 = vpack.c.bf16 %v271_v55, %v268_v54  ;;  %1119 = vmatpush3.bf16.msra.mxu1 %v279_v48  ;;  %v1149_v20 = vpop.eup %1148  ;;  %v558_v48 = vadd.f32 1e-10, %v368_v37  ;;  %v559_v55 = vadd.f32 1e-10, %v371_v46 }
 0x16a   :  { %v280_v62 = vpack.c.bf16 %v263_v26, %v260_v57  ;;  %v1151_v29 = vpop.eup %1150  ;;  %v560_v26 = vadd.f32 1e-10, %v374_v52 }
 0x16b   :  { %v1153_v32 = vpop.eup %1152  ;;  %1172 = vrcp.f32 %v558_v48 }
 0x16c   :  { %1113 = vmatmul.mubr.msk.bf16.gmra.mrb[4].mxu1 %vm326_vm1, %v378_v58  ;;  %1120 = vmatprep.subr.bf16.mxu1 %v280_v62  ;;  %v1155_v35 = vpop.eup %1154  ;;  %1174 = vrcp.f32 %v559_v55 }
 0x16d   :  { %1121 = vmatpush3.bf16.msra.mxu1 %v280_v62  ;;  %1124 = vmatprep.mubr.msk.bf16.mxu1 %vm326_vm1, %v379_v61  ;;  %v1157_v39 = vpop.eup %1156  ;;  %1176 = vrcp.f32 %v560_v26 }
 0x16e   :  { %1122 = vmatprep.subr.bf16.mxu1 %v281_v59  ;;  %v1159_v51 = vpop.eup %1158 }
 0x16f   :  { %v1161_v53 = vpop.eup %1160 }
 0x170   :  { %v1163_v56 = vpop.eup %1162 }
 0x171   :  { %1123 = vmatpush3.bf16.msra.mxu1 %v281_v59  ;;  %v1165_v58 = vpop.eup %1164 }
 0x172   :  { %v1167_v1 = vpop.eup %1166 }
 0x173   :  { %v1169_v3 = vpop.eup %1168 }
 0x174   :  { %1125 = vmatmul.mubr.msk.bf16.vlgmr.msra.gmra.mrb[8].mxu1 %vm326_vm1, %v380_v63  ;;  %v1171_v4 = vpop.eup %1170 }
 0x175   :  { %1128 = vmatprep.mubr.msk.bf16.mxu1 %vm326_vm1, %v381_v0  ;;  %v1173_v7 = vpop.eup %1172 }
 0x176   :  { %v1175_v10 = vpop.eup %1174 }
 0x177   :  { %v1177_v13 = vpop.eup %1176 }
 0x17c   :  { %1129 = vmatmul.mubr.msk.bf16.gmra.mrb[12].mxu1 %vm326_vm1, %v382_v28 }
 0x237   :  { %v1110_v21 = vpop.f32.mrb[0].mxu1 }
 0x238   :  { %v1610_v23 = vmul.f32 %v1147_v16, %v1110_v21  ;;  %v437_v24 = vpop.f32.mrb[1].mxu1  ;;  %v612_v16 = vand.u32 127, %v611_v15 }
 0x239   :  { %v1111_v25 = vpop.f32.mrb[2].mxu1  ;;  %v1615_v34 = vmul.f32 %v1151_v29, %v437_v24 }
 0x23a   :  { %v1612_v30 = vmul.f32 %v1149_v20, %v1111_v25  ;;  %620 = vadd.xlane.f32.xlu0 %v1610_v23  ;;  %v440_v31 = vpop.f32.mrb[3].mxu1  ;;  %vm613_vm2 = vcmp.lt.s32.totalorder %v612_v16, 32  ;;  %v1416_v20 = vmov 0.0  }
 0x23b   :  { %v1618_v38 = vmul.f32 %v1153_v32, %v440_v31  ;;  %v1658_v21 = vsel %vm613_vm2, 1.0, %v1416_v20 }
 0x23c   :  { %622 = vadd.xlane.f32.xlu1 %v1612_v30 }
 0x23e   :  { %616 = vadd.xlane.f32.xlu0 %v1615_v34 }
 0x23f   :  { %v1114_v41 = vpop.f32.mrb[4].mxu1 }
 0x240   :  { %v1621_v43 = vmul.f32 %v1155_v35, %v1114_v41  ;;  %618 = vadd.xlane.f32.xlu1 %v1618_v38  ;;  %v453_v44 = vpop.f32.mrb[5].mxu1 }
 0x241   :  { %v1115_v45 = vpop.f32.mrb[6].mxu1  ;;  %v1627_v54 = vmul.f32 %v1159_v51, %v453_v44 }
 0x242   :  { %v1624_v49 = vmul.f32 %v1157_v39, %v1115_v45  ;;  %628 = vadd.xlane.f32.xlu0 %v1621_v43  ;;  %v456_v50 = vpop.f32.mrb[7].mxu1 }
 0x243   :  { %v1630_v57 = vmul.f32 %v1161_v53, %v456_v50 }
 0x244   :  { %630 = vadd.xlane.f32.xlu1 %v1624_v49 }
 0x246   :  { %624 = vadd.xlane.f32.xlu0 %v1627_v54 }
 0x247   :  { %v1126_v59 = vpop.f32.mrb[8].mxu1 }
 0x248   :  { %v1633_v61 = vmul.f32 %v1163_v56, %v1126_v59  ;;  %626 = vadd.xlane.f32.xlu1 %v1630_v57  ;;  %v514_v62 = vpop.f32.mrb[9].mxu1 }
 0x249   :  { %v1127_v63 = vpop.f32.mrb[10].mxu1  ;;  %v1639_v2 = vmul.f32 %v1167_v1, %v514_v62 }
 0x24a   :  { %v1636_v0 = vmul.f32 %v1165_v58, %v1127_v63  ;;  %636 = vadd.xlane.f32.xlu0 %v1633_v61  ;;  %v517_v28 = vpop.f32.mrb[11].mxu1 }
 0x24b   :  { %v1642_v5 = vmul.f32 %v1169_v3, %v517_v28 }
 0x24c   :  { %638 = vadd.xlane.f32.xlu1 %v1636_v0 }
 0x24e   :  { %632 = vadd.xlane.f32.xlu0 %v1639_v2 }
 0x24f   :  { %v1130_v6 = vpop.f32.mrb[12].mxu1 }
 0x250   :  { %634 = vadd.xlane.f32.xlu1 %v1642_v5  ;;  %v530_v8 = vpop.f32.mrb[13].mxu1  ;;  %v1651_v60 = vmul.f32 %v1175_v10, %v1130_v6 }
 0x251   :  { %v1646_v47 = vmul.f32 %v1171_v4, %v530_v8  ;;  %v1131_v9 = vpop.f32.mrb[14].mxu1 }
 0x252   :  { %v533_v11 = vpop.f32.mrb[15].mxu1  ;;  %v1654_v14 = vmul.f32 %v1177_v13, %v1131_v9 }
 0x253   :  { %v1648_v12 = vmul.f32 %v1173_v7, %v533_v11  ;;  %640 = vadd.xlane.f32.xlu0 %v1646_v47 }
 0x255   :  { %642 = vadd.xlane.f32.xlu1 %v1648_v12 }
 0x257   :  { %644 = vadd.xlane.f32.xlu0 %v1651_v60 }
 0x259   :  { %646 = vadd.xlane.f32.xlu1 %v1654_v14 }
 0x2c7   :  { %v621_v17 = vpop.xlane.xlu0 %620 }
 0x2c8   :  { %v650_v18 = vmul.f32 0.03125, %v621_v17 }
 0x2c9   :  { %v623_v19 = vpop.xlane.xlu1 %622 }
 0x2ca   :  { %v1661_v22 = vsub.f32 %v1610_v23, %v650_v18  ;;  %v651_v24 = vmul.f32 0.03125, %v623_v19 }
 0x2cb   :  { %v617_v25 = vpop.xlane.xlu0 %616 }
 0x2cc   :  { %v1664_v27 = vsub.f32 %v1612_v30, %v651_v24  ;;  %v648_v29 = vmul.f32 0.03125, %v617_v25  ;;  %v682_v31 = vmul.f32 %v1658_v21, %v1661_v22 }
 0x2cd   :  { %v619_v32 = vpop.xlane.xlu1 %618 }
 0x2ce   :  { %v1669_v33 = vsub.f32 %v1615_v34, %v648_v29  ;;  %v649_v35 = vmul.f32 0.03125, %v619_v32  ;;  %v698_v36 = vmul.f32 %v682_v31, %v682_v31  ;;  %v683_v37 = vmul.f32 %v1658_v21, %v1664_v27 }
 0x2cf   :  { %v629_v23 = vpop.xlane.xlu0 %628 }
 0x2d0   :  { %v1674_v39 = vsub.f32 %v1618_v38, %v649_v35  ;;  %v654_v40 = vmul.f32 0.03125, %v629_v23  ;;  %716 = vadd.xlane.f32.xlu0 %v698_v36  ;;  %v699_v30 = vmul.f32 %v683_v37, %v683_v37  ;;  %v680_v41 = vmul.f32 %v1658_v21, %v1669_v33 }
 0x2d1   :  { %v631_v42 = vpop.xlane.xlu1 %630 }
 0x2d2   :  { %v1679_v44 = vsub.f32 %v1621_v43, %v654_v40  ;;  %v655_v34 = vmul.f32 0.03125, %v631_v42  ;;  %718 = vadd.xlane.f32.xlu1 %v699_v30  ;;  %v696_v45 = vmul.f32 %v680_v41, %v680_v41  ;;  %v681_v46 = vmul.f32 %v1658_v21, %v1674_v39 }
 0x2d3   :  { %v625_v48 = vpop.xlane.xlu0 %624 }
 0x2d4   :  { %v1684_v38 = vsub.f32 %v1624_v49, %v655_v34  ;;  %v652_v50 = vmul.f32 0.03125, %v625_v48  ;;  %712 = vadd.xlane.f32.xlu0 %v696_v45  ;;  %v697_v51 = vmul.f32 %v681_v46, %v681_v46  ;;  %v686_v52 = vmul.f32 %v1658_v21, %v1679_v44 }
 0x2d5   :  { %v627_v53 = vpop.xlane.xlu1 %626 }
 0x2d6   :  { %v1689_v43 = vsub.f32 %v1627_v54, %v652_v50  ;;  %v653_v55 = vmul.f32 0.03125, %v627_v53  ;;  %714 = vadd.xlane.f32.xlu1 %v697_v51  ;;  %v702_v56 = vmul.f32 %v686_v52, %v686_v52  ;;  %v687_v26 = vmul.f32 %v1658_v21, %v1684_v38 }
 0x2d7   :  { %v637_v58 = vpop.xlane.xlu0 %636 }
 0x2d8   :  { %v1694_v49 = vsub.f32 %v1630_v57, %v653_v55  ;;  %v658_v59 = vmul.f32 0.03125, %v637_v58  ;;  %724 = vadd.xlane.f32.xlu0 %v702_v56  ;;  %v703_v62 = vmul.f32 %v687_v26, %v687_v26  ;;  %v684_v63 = vmul.f32 %v1658_v21, %v1689_v43 }
 0x2d9   :  { %v639_v28 = vpop.xlane.xlu1 %638 }
 0x2da   :  { %v1699_v54 = vsub.f32 %v1633_v61, %v658_v59  ;;  %v659_v1 = vmul.f32 0.03125, %v639_v28  ;;  %726 = vadd.xlane.f32.xlu1 %v703_v62  ;;  %v700_v3 = vmul.f32 %v684_v63, %v684_v63  ;;  %v685_v4 = vmul.f32 %v1658_v21, %v1694_v49 }
 0x2db   :  { %v633_v6 = vpop.xlane.xlu0 %632 }
 0x2dc   :  { %v1704_v57 = vsub.f32 %v1636_v0, %v659_v1  ;;  %v656_v7 = vmul.f32 0.03125, %v633_v6  ;;  %720 = vadd.xlane.f32.xlu0 %v700_v3  ;;  %v701_v8 = vmul.f32 %v685_v4, %v685_v4  ;;  %v690_v9 = vmul.f32 %v1658_v21, %v1699_v54 }
 0x2dd   :  { %v635_v10 = vpop.xlane.xlu1 %634 }
 0x2de   :  { %v1709_v61 = vsub.f32 %v1639_v2, %v656_v7  ;;  %v657_v11 = vmul.f32 0.03125, %v635_v10  ;;  %722 = vadd.xlane.f32.xlu1 %v701_v8  ;;  %v706_v13 = vmul.f32 %v690_v9, %v690_v9  ;;  %v691_v15 = vmul.f32 %v1658_v21, %v1704_v57 }
 0x2e0   :  { %v1714_v16 = vsub.f32 %v1642_v5, %v657_v11  ;;  %732 = vadd.xlane.f32.xlu0 %v706_v13  ;;  %v641_v0 = vpop.xlane.xlu0 %640  ;;  %v707_v17 = vmul.f32 %v691_v15, %v691_v15  ;;  %v688_v18 = vmul.f32 %v1658_v21, %v1709_v61 }
 0x2e1   :  { %v660_v19 = vmul.f32 0.03125, %v641_v0 }
 0x2e2   :  { %734 = vadd.xlane.f32.xlu1 %v707_v17  ;;  %v643_v20 = vpop.xlane.xlu1 %642  ;;  %v704_v2 = vmul.f32 %v688_v18, %v688_v18  ;;  %v689_v24 = vmul.f32 %v1658_v21, %v1714_v16 }
 0x2e3   :  { %v1721_v25 = vsub.f32 %v1646_v47, %v660_v19  ;;  %v661_v29 = vmul.f32 0.03125, %v643_v20 }
 0x2e4   :  { %728 = vadd.xlane.f32.xlu0 %v704_v2  ;;  %v645_v5 = vpop.xlane.xlu0 %644  ;;  %v705_v31 = vmul.f32 %v689_v24, %v689_v24 }
 0x2e5   :  { %v1724_v32 = vsub.f32 %v1648_v12, %v661_v29  ;;  %v662_v35 = vmul.f32 0.03125, %v645_v5  ;;  %v692_v36 = vmul.f32 %v1658_v21, %v1721_v25 }
 0x2e6   :  { %730 = vadd.xlane.f32.xlu1 %v705_v31  ;;  %v647_v37 = vpop.xlane.xlu1 %646 }
 0x2e7   :  { %v1729_v23 = vsub.f32 %v1651_v60, %v662_v35  ;;  %v663_v40 = vmul.f32 0.03125, %v647_v37  ;;  %v708_v30 = vmul.f32 %v692_v36, %v692_v36  ;;  %v693_v47 = vmul.f32 %v1658_v21, %v1724_v32 }
 0x2e9   :  { %v1734_v41 = vsub.f32 %v1654_v14, %v663_v40  ;;  %736 = vadd.xlane.f32.xlu0 %v708_v30  ;;  %v709_v12 = vmul.f32 %v693_v47, %v693_v47  ;;  %v694_v42 = vmul.f32 %v1658_v21, %v1729_v23 }
 0x2eb   :  { %738 = vadd.xlane.f32.xlu1 %v709_v12  ;;  %v710_v34 = vmul.f32 %v694_v42, %v694_v42  ;;  %v695_v45 = vmul.f32 %v1658_v21, %v1734_v41 }
 0x2ed   :  { %740 = vadd.xlane.f32.xlu0 %v710_v34  ;;  %v711_v60 = vmul.f32 %v695_v45, %v695_v45 }
 0x2ef   :  { %742 = vadd.xlane.f32.xlu1 %v711_v60 }
 0x35d   :  { %v717_v46 = vpop.xlane.xlu0 %716 }
 0x35e   :  { %v746_v48 = vmul.f32 0.032258064, %v717_v46 }
 0x35f   :  { %v719_v50 = vpop.xlane.xlu1 %718 }
 0x360   :  { %1178 = vrsqrt.f32 %v746_v48  ;;  %v747_v51 = vmul.f32 0.032258064, %v719_v50  ;;  %vm776_vm3 = vcmp.eq.f32.partialorder %v746_v48, inf  ;;  %vm778_vm4 = vcmp.eq.f32.partialorder %v746_v48, 0.0 }
 0x361   :  { %v713_v14 = vpop.xlane.xlu0 %712  ;;  %v779_v58 = vand.u32 2147483648, %v746_v48 }
 0x362   :  { %v744_v52 = vmul.f32 0.032258064, %v713_v14  ;;  %1180 = vrsqrt.f32 %v747_v51  ;;  %vm783_vm5 = vcmp.eq.f32.partialorder %v747_v51, inf  ;;  %vm785_vm6 = vcmp.eq.f32.partialorder %v747_v51, 0.0 }
 0x363   :  { %v715_v53 = vpop.xlane.xlu1 %714  ;;  %v786_v28 = vand.u32 2147483648, %v747_v51 }
 0x364   :  { %1182 = vrsqrt.f32 %v744_v52  ;;  %v1740_v55 = vmul.f32 0.032258064, %v715_v53  ;;  %vm762_vm7 = vcmp.eq.f32.partialorder %v744_v52, inf  ;;  %vm764_vm8 = vcmp.eq.f32.partialorder %v744_v52, 0.0 }
 0x365   :  { %v725_v56 = vpop.xlane.xlu0 %724  ;;  %v765_v4 = vand.u32 2147483648, %v744_v52 }
 0x366   :  { %v1742_v26 = vmul.f32 0.032258064, %v725_v56  ;;  %1184 = vrsqrt.f32 %v1740_v55  ;;  %vm769_vm9 = vcmp.eq.f32.partialorder %v1740_v55, inf  ;;  %vm771_vm10 = vcmp.eq.f32.partialorder %v1740_v55, 0.0 }
 0x367   :  { %v727_v21 = vpop.xlane.xlu1 %726  ;;  %v772_v7 = vand.u32 2147483648, %v1740_v55 }
 0x368   :  { %1186 = vrsqrt.f32 %v1742_v26  ;;  %v1746_v59 = vmul.f32 0.032258064, %v727_v21  ;;  %vm804_vm11 = vcmp.eq.f32.partialorder %v1742_v26, inf  ;;  %vm806_vm12 = vcmp.eq.f32.partialorder %v1742_v26, 0.0 }
 0x369   :  { %v721_v62 = vpop.xlane.xlu0 %720  ;;  %v807_v17 = vand.u32 2147483648, %v1742_v26 }
 0x36a   :  { %v1179_v63 = vpop.eup %1178  ;;  %v1748_v1 = vmul.f32 0.032258064, %v721_v62  ;;  %1188 = vrsqrt.f32 %v1746_v59  ;;  %vm811_vm13 = vcmp.eq.f32.partialorder %v1746_v59, inf  ;;  %vm813_vm14 = vcmp.eq.f32.partialorder %v1746_v59, 0.0 }
 0x36b   :  { %v775_v3 = vmul.f32 %v1179_v63, %v746_v48  ;;  %v723_v6 = vpop.xlane.xlu1 %722  ;;  %v814_v29 = vand.u32 2147483648, %v1746_v59 }
 0x36c   :  { %1190 = vrsqrt.f32 %v1748_v1  ;;  %v1181_v8 = vpop.eup %1180  ;;  %v1758_v10 = vmul.f32 0.032258064, %v723_v6  ;;  %vm790_vm15 = vcmp.eq.f32.partialorder %v1748_v1, inf  ;;  %vm792_vm0 = vcmp.eq.f32.partialorder %v1748_v1, 0.0 }
 0x36d   :  { %v777_v9 = vsel %vm776_vm3, %v746_v48, %v775_v3  ;;  %v733_v11 = vpop.xlane.xlu0 %732  ;;  %v782_v0 = vmul.f32 %v1181_v8, %v747_v51  ;;  %v793_v34 = vand.u32 2147483648, %v1748_v1 }
 0x36e   :  { %v1183_v13 = vpop.eup %1182  ;;  %v780_v15 = vsel %vm778_vm4, %v779_v58, %v777_v9  ;;  %v1762_v18 = vmul.f32 0.032258064, %v733_v11  ;;  %1192 = vrsqrt.f32 %v1758_v10  ;;  %vm797_vm1 = vcmp.eq.f32.partialorder %v1758_v10, inf }
 0x36f   :  { %v874_v19 = vadd.f32 0.001, %v780_v15  ;;  %v761_v20 = vmul.f32 %v1183_v13, %v744_v52  ;;  %v735_v2 = vpop.xlane.xlu1 %734  ;;  %v784_v24 = vsel %vm783_vm5, %v747_v51, %v782_v0  ;;  %vm799_vm2 = vcmp.eq.f32.partialorder %v1758_v10, 0.0  ;;  %v1815_v15 = vld [vmem:[#allocation11] ss:$0 sm:$0xff] }
 0x370   :  { %1194 = vrsqrt.f32 %v1762_v18  ;;  %v1185_v5 = vpop.eup %1184  ;;  %v787_v31 = vsel %vm785_vm6, %v786_v28, %v784_v24  ;;  %v1778_v45 = vmul.f32 0.032258064, %v735_v2  ;;  %vm832_vm3 = vcmp.eq.f32.partialorder %v1762_v18, inf  ;;  %v1825_v2 = vld [vmem:[#allocation12] ss:$0 sm:$0xff] }
 0x371   :  { %1196 = vrcp.f32 %v874_v19  ;;  %v763_v35 = vsel %vm762_vm7, %v744_v52, %v761_v20  ;;  %v875_v37 = vadd.f32 0.001, %v787_v31  ;;  %v768_v30 = vmul.f32 %v1185_v5, %v1740_v55  ;;  %v729_v47 = vpop.xlane.xlu0 %728 }
 0x372   :  { %v1187_v36 = vpop.eup %1186  ;;  %v766_v40 = vsel %vm764_vm8, %v765_v4, %v763_v35  ;;  %v1790_v14 = vmul.f32 0.032258064, %v729_v47  ;;  %vm834_vm4 = vcmp.eq.f32.partialorder %v1762_v18, 0.0  ;;  %v835_v6 = vand.u32 2147483648, %v1762_v18 }
 0x373   :  { %v872_v12 = vadd.f32 0.001, %v766_v40  ;;  %v803_v42 = vmul.f32 %v1187_v36, %v1742_v26  ;;  %1198 = vrcp.f32 %v875_v37  ;;  %v770_v60 = vsel %vm769_vm9, %v1740_v55, %v768_v30  ;;  %v731_v46 = vpop.xlane.xlu1 %730 }
 0x374   :  { %v1189_v48 = vpop.eup %1188  ;;  %v773_v50 = vsel %vm771_vm10, %v772_v7, %v770_v60  ;;  %v800_v55 = vand.u32 2147483648, %v1758_v10  ;;  %v1798_v63 = vmul.f32 0.032258064, %v731_v46  ;;  %vm839_vm5 = vcmp.eq.f32.partialorder %v1778_v45, inf }
 0x375   :  { %1200 = vrcp.f32 %v872_v12  ;;  %v805_v51 = vsel %vm804_vm11, %v1742_v26, %v803_v42  ;;  %v873_v53 = vadd.f32 0.001, %v773_v50  ;;  %v810_v21 = vmul.f32 %v1189_v48, %v1746_v59 }
 0x376   :  { %v1191_v52 = vpop.eup %1190  ;;  %v808_v56 = vsel %vm806_vm12, %v807_v17, %v805_v51  ;;  %1202 = vrsqrt.f32 %v1778_v45  ;;  %v737_v17 = vpop.xlane.xlu0 %736  ;;  %vm841_vm6 = vcmp.eq.f32.partialorder %v1778_v45, 0.0  ;;  %vm818_vm7 = vcmp.eq.f32.partialorder %v1790_v14, inf }
 0x377   :  { %v878_v58 = vadd.f32 0.001, %v808_v56  ;;  %v789_v62 = vmul.f32 %v1191_v52, %v1748_v1  ;;  %1204 = vrcp.f32 %v873_v53  ;;  %v812_v28 = vsel %vm811_vm13, %v1746_v59, %v810_v21 }
 0x378   :  { %v1193_v26 = vpop.eup %1192  ;;  %v815_v3 = vsel %vm813_vm14, %v814_v29, %v812_v28  ;;  %v739_v20 = vpop.xlane.xlu1 %738  ;;  %v1837_v37 = vmul.f32 0.032258064, %v737_v17  ;;  %vm820_vm8 = vcmp.eq.f32.partialorder %v1790_v14, 0.0  ;;  %vm825_vm9 = vcmp.eq.f32.partialorder %v1798_v63, inf }
 0x379   :  { %1206 = vrcp.f32 %v878_v58  ;;  %v791_v4 = vsel %vm790_vm15, %v1748_v1, %v789_v62  ;;  %v879_v8 = vadd.f32 0.001, %v815_v3  ;;  %v796_v11 = vmul.f32 %v1193_v26, %v1758_v10 }
 0x37a   :  { %v1195_v7 = vpop.eup %1194  ;;  %v794_v9 = vsel %vm792_vm0, %v793_v34, %v791_v4  ;;  %1208 = vrsqrt.f32 %v1790_v14  ;;  %v1841_v47 = vmul.f32 0.032258064, %v739_v20  ;;  %vm827_vm10 = vcmp.eq.f32.partialorder %v1798_v63, 0.0  ;;  %v741_v56 = vpop.xlane.xlu0 %740 }
 0x37b   :  { %v1197_v13 = vpop.eup %1196  ;;  %v876_v59 = vadd.f32 0.001, %v794_v9  ;;  %v831_v0 = vmul.f32 %v1195_v7, %v1762_v18  ;;  %1210 = vrsqrt.f32 %v1798_v63  ;;  %v798_v1 = vsel %vm797_vm1, %v1758_v10, %v796_v11 }
 0x37c   :  { %v922_v19 = vmul.f32 %v1197_v13, %v1661_v22  ;;  %1212 = vrcp.f32 %v879_v8  ;;  %v801_v24 = vsel %vm799_vm2, %v800_v55, %v798_v1  ;;  %v842_v22 = vand.u32 2147483648, %v1778_v45 }
 0x37d   :  { %1214 = vrcp.f32 %v876_v59  ;;  %v833_v29 = vsel %vm832_vm3, %v1762_v18, %v831_v0  ;;  %v1199_v5 = vpop.eup %1198  ;;  %v877_v35 = vadd.f32 0.001, %v801_v24  ;;  %v821_v18 = vand.u32 2147483648, %v1790_v14 }
 0x37e   :  { %v944_v31 = vmul.f32 %v1815_v15, %v922_v19  ;;  %v836_v36 = vsel %vm834_vm4, %v835_v6, %v833_v29  ;;  %v923_v10 = vmul.f32 %v1199_v5, %v1664_v27  ;;  %v828_v28 = vand.u32 2147483648, %v1798_v63 }
 0x37f   :  { %v1201_v40 = vpop.eup %1200  ;;  %v882_v30 = vadd.f32 0.001, %v836_v36  ;;  %1216 = vrcp.f32 %v877_v35  ;;  %v1867_v13 = vmul.f32 0.032258064, %v741_v56  ;;  %vm846_vm11 = vcmp.eq.f32.partialorder %v1837_v37, inf }
 0x380   :  { %v1203_v12 = vpop.eup %1202  ;;  %v966_v42 = vadd.f32 %v1825_v2, %v944_v31  ;;  %v920_v34 = vmul.f32 %v1201_v40, %v1669_v33  ;;  %v945_v60 = vmul.f32 %v1815_v15, %v923_v10  ;;  %vm848_vm12 = vcmp.eq.f32.partialorder %v1837_v37, 0.0 }
 0x381   :  { %1218 = vrcp.f32 %v882_v30  ;;  %v838_v46 = vmul.f32 %v1203_v12, %v1778_v45  ;;  %v1205_v27 = vpop.eup %1204  ;;  %v849_v12 = vand.u32 2147483648, %v1837_v37  ;;  %vm853_vm13 = vcmp.eq.f32.partialorder %v1841_v47, inf }
 0x382   :  { %v982_v48 = vmax.f32 %v966_v42, 0.0  ;;  %v942_v50 = vmul.f32 %v1815_v15, %v920_v34  ;;  %1220 = vrsqrt.f32 %v1837_v37  ;;  %v967_v33 = vadd.f32 %v1825_v2, %v945_v60  ;;  %v743_v42 = vpop.xlane.xlu1 %742 }
 0x383   :  { %v1207_v51 = vpop.eup %1206  ;;  %v921_v52 = vmul.f32 %v1205_v27, %v1674_v39  ;;  %v840_v53 = vsel %vm839_vm5, %v1778_v45, %v838_v46  ;;  %1222 = vrsqrt.f32 %v1841_v47  ;;  %vm855_vm14 = vcmp.eq.f32.partialorder %v1841_v47, 0.0 }
 0x384   :  { %v1209_v21 = vpop.eup %1208  ;;  %998 = vst [vmem:[#allocation14 + $0x10] sm:$0xff] %v982_v48  ;;  %v964_v58 = vadd.f32 %v1825_v2, %v942_v50  ;;  %v926_v62 = vmul.f32 %v1207_v51, %v1679_v44  ;;  %v843_v55 = vsel %vm841_vm6, %v842_v22, %v840_v53  ;;  %v983_v39 = vmax.f32 %v967_v33, 0.0 }
 0x385   :  { %v1211_v26 = vpop.eup %1210  ;;  %v943_v3 = vmul.f32 %v1815_v15, %v921_v52  ;;  %v883_v4 = vadd.f32 0.001, %v843_v55  ;;  %v817_v6 = vmul.f32 %v1209_v21, %v1790_v14  ;;  %v856_v51 = vand.u32 2147483648, %v1841_v47 }
 0x386   :  { %v1213_v7 = vpop.eup %1212  ;;  %v980_v8 = vmax.f32 %v964_v58, 0.0  ;;  %v948_v9 = vmul.f32 %v1815_v15, %v926_v62  ;;  %v824_v11 = vmul.f32 %v1211_v26, %v1798_v63  ;;  %999 = vst [vmem:[#allocation14 + $0x18] sm:$0xff] %v983_v39  ;;  %v759_v33 = vmul.f32 0.032258064, %v743_v42 }
 0x387   :  { %v1215_v44 = vpop.eup %1214  ;;  %v965_v45 = vadd.f32 %v1825_v2, %v943_v3  ;;  %v927_v59 = vmul.f32 %v1213_v7, %v1684_v38  ;;  %1224 = vrcp.f32 %v883_v4  ;;  %v819_v0 = vsel %vm818_vm7, %v1790_v14, %v817_v6 }
 0x388   :  { %996 = vst [vmem:[#allocation14] sm:$0xff] %v980_v8  ;;  %v970_v17 = vadd.f32 %v1825_v2, %v948_v9  ;;  %v924_v19 = vmul.f32 %v1215_v44, %v1689_v43  ;;  %v822_v1 = vsel %vm820_vm8, %v821_v18, %v819_v0  ;;  %v826_v20 = vsel %vm825_vm9, %v1798_v63, %v824_v11 }
 0x389   :  { %v981_v24 = vmax.f32 %v965_v45, 0.0  ;;  %v949_v38 = vmul.f32 %v1815_v15, %v927_v59  ;;  %v880_v29 = vadd.f32 0.001, %v822_v1  ;;  %v829_v22 = vsel %vm827_vm10, %v828_v28, %v826_v20  ;;  %v1217_v5 = vpop.eup %1216 }
 0x38a   :  { %v986_v31 = vmax.f32 %v970_v17, 0.0  ;;  %v946_v35 = vmul.f32 %v1815_v15, %v924_v19  ;;  %v881_v36 = vadd.f32 0.001, %v829_v22  ;;  %v925_v40 = vmul.f32 %v1217_v5, %v1694_v49 }
 0x38b   :  { %v1219_v43 = vpop.eup %1218  ;;  %997 = vst [vmem:[#allocation14 + $0x8] sm:$0xff] %v981_v24  ;;  %v971_v14 = vadd.f32 %v1825_v2, %v949_v38  ;;  %1226 = vrcp.f32 %v880_v29  ;;  %vm860_vm15 = vcmp.eq.f32.partialorder %v1867_v13, inf  ;;  %v863_v45 = vand.u32 2147483648, %v1867_v13 }
 0x38c   :  { %v1221_v10 = vpop.eup %1220  ;;  %1002 = vst [vmem:[#allocation14 + $0x30] sm:$0xff] %v986_v31  ;;  %v968_v63 = vadd.f32 %v1825_v2, %v946_v35  ;;  %v930_v30 = vmul.f32 %v1219_v43, %v1699_v54  ;;  %1228 = vrcp.f32 %v881_v36  ;;  %v947_v60 = vmul.f32 %v1815_v15, %v925_v40 }
 0x38d   :  { %v1223_v34 = vpop.eup %1222  ;;  %v987_v18 = vmax.f32 %v971_v14, 0.0  ;;  %v845_v46 = vmul.f32 %v1221_v10, %v1837_v37  ;;  %1230 = vrsqrt.f32 %v1867_v13  ;;  %vm862_vm0 = vcmp.eq.f32.partialorder %v1867_v13, 0.0 }
 0x38e   :  { %v984_v49 = vmax.f32 %v968_v63, 0.0  ;;  %v952_v27 = vmul.f32 %v1815_v15, %v930_v30  ;;  %v852_v48 = vmul.f32 %v1223_v34, %v1841_v47  ;;  %v969_v54 = vadd.f32 %v1825_v2, %v947_v60 }
 0x38f   :  { %1003 = vst [vmem:[#allocation14 + $0x38] sm:$0xff] %v987_v18  ;;  %v847_v50 = vsel %vm846_vm11, %v1837_v37, %v845_v46  ;;  %1232 = vrsqrt.f32 %v759_v33  ;;  %vm867_vm1 = vcmp.eq.f32.partialorder %v759_v33, inf  ;;  %v870_v29 = vand.u32 2147483648, %v759_v33 }
 0x390   :  { %1000 = vst [vmem:[#allocation14 + $0x20] sm:$0xff] %v984_v49  ;;  %v974_v52 = vadd.f32 %v1825_v2, %v952_v27  ;;  %v850_v53 = vsel %vm848_vm12, %v849_v12, %v847_v50  ;;  %v854_v56 = vsel %vm853_vm13, %v1841_v47, %v852_v48  ;;  %v985_v58 = vmax.f32 %v969_v54, 0.0 }
 0x391   :  { %v1225_v21 = vpop.eup %1224  ;;  %v884_v62 = vadd.f32 0.001, %v850_v53  ;;  %v857_v55 = vsel %vm855_vm14, %v856_v51, %v854_v56  ;;  %vm869_vm2 = vcmp.eq.f32.partialorder %v759_v33, 0.0 }
 0x392   :  { %v990_v28 = vmax.f32 %v974_v52, 0.0  ;;  %v931_v26 = vmul.f32 %v1225_v21, %v1704_v57  ;;  %v885_v39 = vadd.f32 0.001, %v857_v55  ;;  %1001 = vst [vmem:[#allocation14 + $0x28] sm:$0xff] %v985_v58 }
 0x393   :  { %1234 = vrcp.f32 %v884_v62 }
 0x394   :  { %1006 = vst [vmem:[#allocation14 + $0x50] sm:$0xff] %v990_v28  ;;  %v953_v3 = vmul.f32 %v1815_v15, %v931_v26  ;;  %1236 = vrcp.f32 %v885_v39 }
 0x395   :  { %v1227_v37 = vpop.eup %1226 }
 0x396   :  { %v1229_v4 = vpop.eup %1228  ;;  %v975_v6 = vadd.f32 %v1825_v2, %v953_v3  ;;  %v928_v47 = vmul.f32 %v1227_v37, %v1709_v61 }
 0x397   :  { %v1231_v7 = vpop.eup %1230  ;;  %v929_v8 = vmul.f32 %v1229_v4, %v1714_v16 }
 0x398   :  { %v991_v9 = vmax.f32 %v975_v6, 0.0  ;;  %v950_v11 = vmul.f32 %v1815_v15, %v928_v47  ;;  %v859_v57 = vmul.f32 %v1231_v7, %v1867_v13 }
 0x399   :  { %v951_v44 = vmul.f32 %v1815_v15, %v929_v8  ;;  %v1233_v61 = vpop.eup %1232 }
 0x39a   :  { %1007 = vst [vmem:[#allocation14 + $0x58] sm:$0xff] %v991_v9  ;;  %v972_v59 = vadd.f32 %v1825_v2, %v950_v11  ;;  %v861_v0 = vsel %vm860_vm15, %v1867_v13, %v859_v57  ;;  %v866_v20 = vmul.f32 %v1233_v61, %v759_v33 }
 0x39b   :  { %v973_v16 = vadd.f32 %v1825_v2, %v951_v44  ;;  %v864_v17 = vsel %vm862_vm0, %v863_v45, %v861_v0 }
 0x39c   :  { %v988_v19 = vmax.f32 %v972_v59, 0.0  ;;  %v886_v1 = vadd.f32 0.001, %v864_v17  ;;  %v868_v31 = vsel %vm867_vm1, %v759_v33, %v866_v20 }
 0x39d   :  { %v1235_v24 = vpop.eup %1234  ;;  %v989_v38 = vmax.f32 %v973_v16, 0.0  ;;  %v871_v35 = vsel %vm869_vm2, %v870_v29, %v868_v31 }
 0x39e   :  { %v1237_v22 = vpop.eup %1236  ;;  %1004 = vst [vmem:[#allocation14 + $0x40] sm:$0xff] %v988_v19  ;;  %v932_v5 = vmul.f32 %v1235_v24, %v1721_v25  ;;  %1238 = vrcp.f32 %v886_v1  ;;  %v887_v43 = vadd.f32 0.001, %v871_v35 }
 0x39f   :  { %1005 = vst [vmem:[#allocation14 + $0x48] sm:$0xff] %v989_v38  ;;  %v933_v13 = vmul.f32 %v1237_v22, %v1724_v32 }
 0x3a0   :  { %v954_v36 = vmul.f32 %v1815_v15, %v932_v5  ;;  %1240 = vrcp.f32 %v887_v43 }
 0x3a1   :  { %v955_v14 = vmul.f32 %v1815_v15, %v933_v13 }
 0x3a2   :  { %v976_v40 = vadd.f32 %v1825_v2, %v954_v36 }
 0x3a3   :  { %v977_v10 = vadd.f32 %v1825_v2, %v955_v14 }
 0x3a4   :  { %v992_v63 = vmax.f32 %v976_v40, 0.0 }
 0x3a5   :  { %v993_v30 = vmax.f32 %v977_v10, 0.0 }
 0x3a6   :  { %1008 = vst [vmem:[#allocation14 + $0x60] sm:$0xff] %v992_v63 }
 0x3a7   :  { %1009 = vst [vmem:[#allocation14 + $0x68] sm:$0xff] %v993_v30 }
 0x3a8   :  { %v1239_v25 = vpop.eup %1238 }
 0x3a9   :  { %v934_v12 = vmul.f32 %v1239_v25, %v1729_v23 }
 0x3aa   :  { %v1241_v42 = vpop.eup %1240 }
 0x3ab   :  { %v956_v32 = vmul.f32 %v1815_v15, %v934_v12  ;;  %v935_v18 = vmul.f32 %v1241_v42, %v1734_v41 }
 0x3ad   :  { %v978_v34 = vadd.f32 %v1825_v2, %v956_v32  ;;  %v957_v46 = vmul.f32 %v1815_v15, %v935_v18 }
 0x3af   :  { %v994_v60 = vmax.f32 %v978_v34, 0.0  ;;  %v979_v49 = vadd.f32 %v1825_v2, %v957_v46 }
 0x3b1   :  { %1010 = vst [vmem:[#allocation14 + $0x70] sm:$0xff] %v994_v60  ;;  %v995_v27 = vmax.f32 %v979_v49, 0.0 }
 0x3b3   :  { %1011 = vst [vmem:[#allocation14 + $0x78] sm:$0xff] %v995_v27 }
 0x3b4   :  { %1385 = shalt.err (!%p1382_p10)
}
 0x3b5   :  { %s1386_s29 = scalar_lea.hbm %s1955_s6, 2048 }
 0x3b6   :  { %p1387_p11 = scmp.ne.s32.totalorder %s1955_s6, %s1386_s29  ;;  %p1390_p12 = scmp.lt.u32.totalorder %s1386_s29, %s1955_s6 }
 0x3b8   :  { %p1392_p13 = pnand %p1390_p12, %p1387_p11 }
 0x3ba   :  { %1395 = shalt.err (!%p1392_p13)
}
 0x3bb   :  { %1023 = dma.vmem_to_hbm [thread:$0]  %s1018_s23, 2048, %s1955_s6, [#allocation5], %s1408_s9, %s1408_s9, %s1409_s10  }
 0x3bc   :  { %1404 = dma.done.wait [#allocation5], 2048  }
 0x3bd   :  { %1405 = vsyncadd [#allocation5], 4294965248 }
 0x3be   :  { %1027 = vsyncpa [#allocation4], 1 }
 0x3bf   :  { %1028 = vsyncpa [#allocation7], 1 }
 0x3c0   :  { %1029 = vsyncpa [#allocation10], 1 }
 0x3c1   :  { %1030 = vsyncpa [#allocation13], 1 }
 0x3c2   :  { %1031 = vsyncpa [#allocation5], 1 }

</bundles_post_ra>
